<compile_context>
chip_gen: v7x
topology: tpu7x:2x2x1
jax: 0.10.0
libtpu: 0.0.40
codegen_flags: <defaults>
</compile_context>

<pallas_src>
import jax
import jax.numpy as jnp
import numpy as np
from jax.experimental import pallas as pl
from jax.experimental.pallas import tpu as pltpu


def make_decoder_layer_kernel(heads, d_k, d_v, batch_block, s_enc, s_dec,
                              d_model, eps=1e-5, compute_dtype=jnp.bfloat16):
    """Build the fused decoder-layer kernel for a fixed static configuration."""
    approx_recip = compute_dtype != jnp.float32   # EUP approx reciprocal on fast path

    def layer_norm(x, g_ref, b_ref):
        # x: [bb*S, D] f32; gamma/beta refs: [1, D] f32 (read at point of use)
        mu = jnp.mean(x, axis=-1, keepdims=True)
        var = jnp.mean((x - mu) ** 2, axis=-1, keepdims=True)
        return (x - mu) * jax.lax.rsqrt(var + eps) * g_ref[...] + b_ref[...]

    def proj(x, w_ref, b_ref):
        # slab matmul on [bb*S, in] @ [in, out]; bf16 (or f32) operands, f32 acc
        return (jnp.dot(x.astype(compute_dtype), w_ref[...],
                        preferred_element_type=jnp.float32) + b_ref[...])

    def split_heads(x, s, d):
        # [bb*s, H*d] -> [bb*H, s, d] (batch_block==1 uses the proven 3-D path)
        if batch_block == 1:
            return jnp.swapaxes(x.reshape(s, heads, d), 0, 1)
        x = x.reshape(batch_block, s, heads, d).transpose(0, 2, 1, 3)
        return x.reshape(batch_block * heads, s, d)

    def merge_heads(o, s):
        # [bb*H, s, dv] -> [bb*s, H*dv]
        if batch_block == 1:
            return jnp.swapaxes(o, 0, 1).reshape(s, heads * d_v)
        o = o.reshape(batch_block, heads, s, d_v).transpose(0, 2, 1, 3)
        return o.reshape(batch_block * s, heads * d_v)

    def attention(q, k, v, sq, sk, wo_ref, bo_ref, bias):
        # q: [bb*sq, H*dk] (softmax scale already folded into the Q projection)
        # k: [bb*sk, H*dk], v: [bb*sk, H*dv]
        # TODO(synk): dk=8 head splits are lane-sparse; a block-diagonal single
        # dot_general formulation may beat the per-head batched einsums here.
        qh = split_heads(q, sq, d_k).astype(compute_dtype)   # [bb*H, sq, dk]
        kh = split_heads(k, sk, d_k).astype(compute_dtype)   # [bb*H, sk, dk]
        vh = split_heads(v, sk, d_v).astype(compute_dtype)   # [bb*H, sk, dv]

        # batched-over-(batch, head) score matmul, f32 accumulation
        s = jnp.einsum('gqd,gkd->gqk', qh, kh, preferred_element_type=jnp.float32)
        if bias is not None:
            s = s + bias                                       # additive causal bias
        # softmax in f32 (EUP exp + reciprocal; max-subtracted for stability)
        s = s - jnp.max(s, axis=-1, keepdims=True)
        p = jnp.exp(s)
        p = p * pl.reciprocal(jnp.sum(p, axis=-1, keepdims=True), approx=approx_recip)

        o = jnp.einsum('gqk,gkd->gqd', p.astype(compute_dtype), vh,
                       preferred_element_type=jnp.float32)    # [bb*H, sq, dv]
        o = merge_heads(o, sq)                                 # [bb*sq, H*dv]
        # single concat-heads output projection (wide K dim for the MXU)
        return (jnp.dot(o.astype(compute_dtype), wo_ref[...],
                        preferred_element_type=jnp.float32) + bo_ref[...])

    def kernel(x_enc_ref, x_dec_ref,
               wqkv1_r, bqkv1_r, wo1_r, bo1_r, g1_r, be1_r,
               wq2_r, wkv2_r, bq2_r, bkv2_r, wo2_r, bo2_r, g2_r, be2_r,
               wf1_r, bf1_r, wf2_r, bf2_r, g3_r, be3_r,
               out_ref):
        h_dk = heads * d_k
        bb = batch_block

        # ---- additive causal bias, built once per kernel invocation ----
        row = jax.lax.broadcasted_iota(jnp.int32, (s_dec, s_dec), 0)
        col = jax.lax.broadcasted_iota(jnp.int32, (s_dec, s_dec), 1)
        causal_bias = jnp.where(col > row, jnp.float32(-1e9), jnp.float32(0.0))

        # ---- flatten the whole batch block into one [bb*S, D] slab ----
        x_dec = x_dec_ref[...].reshape(bb * s_dec, d_model)
        x_enc = x_enc_ref[...].reshape(bb * s_enc, d_model)
        x_dec_f32 = x_dec.astype(jnp.float32)

        # ---- masked (causal) self-attention: one fused QKV slab matmul ----
        qkv = proj(x_dec, wqkv1_r, bqkv1_r)                 # [bb*S, 2*H*dk + H*dv]
        attn1 = attention(qkv[:, :h_dk], qkv[:, h_dk:2 * h_dk], qkv[:, 2 * h_dk:],
                          s_dec, s_dec, wo1_r, bo1_r, causal_bias)
        out1 = layer_norm(x_dec_f32 + attn1, g1_r, be1_r)   # drop1 = identity (eval)

        # ---- cross-attention: Q from decoder stream, fused K|V from encoder ----
        q2 = proj(out1, wq2_r, bq2_r)
        kv2 = proj(x_enc, wkv2_r, bkv2_r)
        attn2 = attention(q2, kv2[:, :h_dk], kv2[:, h_dk:],
                          s_dec, s_enc, wo2_r, bo2_r, None)
        out2 = layer_norm(out1 + attn2, g2_r, be2_r)        # drop2 = identity (eval)

        # ---- position-wise feed-forward (slab matmuls) ----
        hid = jnp.maximum(proj(out2, wf1_r, bf1_r), 0.0)    # ReLU; FFN dropout = identity
        ff = proj(hid, wf2_r, bf2_r)
        out3 = layer_norm(out2 + ff, g3_r, be3_r)           # drop3 = identity (eval)

        out_ref[...] = out3.reshape(bb, s_dec, d_model).astype(out_ref.dtype)

    return kernel


def _vmem_limit_bytes(batch_block, s_enc, s_dec, d_model, heads, d_k, d_v,
                      fused_params):
    """Estimate the VMEM footprint and only raise the scoped limit if needed."""
    param_bytes = sum(int(p.size) * p.dtype.itemsize for p in fused_params)
    wide = max([d_model, heads * (2 * d_k + d_v)]
               + [int(p.shape[-1]) for p in fused_params])
    est = (2 * batch_block * (s_enc + 2 * s_dec) * d_model * 4   # double-buffered act blocks
           + 2 * param_bytes                                      # double-buffered params
           + 2 * batch_block * heads * s_dec * max(s_enc, s_dec) * 4   # scores + probs
           + 8 * batch_block * s_dec * wide * 4)                  # projection / FFN slabs
    want = int(est * 1.5)                                         # headroom for compiler scratch
    if want <= 32 * 1024 * 1024:                                  # default scoped limit suffices
        return None
    try:
        phys = pltpu.get_tpu_info().vmem_capacity_bytes
    except Exception:                                             # pragma: no cover
        phys = 64 * 1024 * 1024                                   # conservative: v7x per-TC VMEM
    return min(want, phys * 3 // 4)


def decoder_layer_pallas(x_encoder, x_decoder, params, heads, d_k, d_v,
                         batch_block=1, compute_dtype=jnp.bfloat16, eps=1e-5):
    (wq1, bq1, wk1, bk1, wv1, bv1, wo1, bo1, g1, be1,
     wq2, bq2, wk2, bk2, wv2, bv2, wo2, bo2, g2, be2,
     wf1, bf1, wf2, bf2, g3, be3) = params

    B, S_dec, D = x_decoder.shape
    _, S_enc, _ = x_encoder.shape
    if B % batch_block != 0:
        raise ValueError(f"batch size {B} must be divisible by batch_block {batch_block}")

    scale = jnp.float32(1.0 / np.sqrt(d_k))
    row2 = lambda v: jnp.asarray(v, jnp.float32).reshape(1, -1)   # 1-D -> [1, n] (TPU-friendly)
    cd = lambda w: jnp.asarray(w).astype(compute_dtype)           # matmul operands

    # Fold the softmax scale into the Q projection; fuse Q|K|V (self) and K|V (cross).
    # TODO(synk): for production configs, pad these fused widths to multiples of
    # 128 (v5e) / 256 (v6e, v7x) so each MXU pass is fully utilized.
    wqkv1 = cd(jnp.concatenate([wq1 * scale, wk1, wv1], axis=1))
    bqkv1 = row2(jnp.concatenate([bq1 * scale, bk1, bv1]))
    wq2s = cd(wq2 * scale)
    bq2s = row2(bq2 * scale)
    wkv2 = cd(jnp.concatenate([wk2, wv2], axis=1))
    bkv2 = row2(jnp.concatenate([bk2, bv2]))

    fused_params = [
        wqkv1, bqkv1, cd(wo1), row2(bo1), row2(g1), row2(be1),
        wq2s, wkv2, bq2s, bkv2, cd(wo2), row2(bo2), row2(g2), row2(be2),
        cd(wf1), row2(bf1), cd(wf2), row2(bf2), row2(g3), row2(be3),
    ]

    kernel = make_decoder_layer_kernel(heads, d_k, d_v, batch_block, S_enc, S_dec,
                                       D, eps=eps, compute_dtype=compute_dtype)

    def full_spec(p):
        nd = p.ndim
        return pl.BlockSpec(p.shape, lambda b, _nd=nd: (0,) * _nd)

    in_specs = [
        pl.BlockSpec((batch_block, S_enc, D), lambda b: (b, 0, 0)),
        pl.BlockSpec((batch_block, S_dec, D), lambda b: (b, 0, 0)),
    ] + [full_spec(p) for p in fused_params]

    out_specs = pl.BlockSpec((batch_block, S_dec, D), lambda b: (b, 0, 0))

    return pl.pallas_call(
        kernel,
        out_shape=jax.ShapeDtypeStruct((B, S_dec, D), x_decoder.dtype),
        grid_spec=pltpu.PrefetchScalarGridSpec(
            num_scalar_prefetch=0,
            grid=(B // batch_block,),          # >= 2 parallel steps for B >= 2
            in_specs=in_specs,
            out_specs=out_specs,
        ),
        compiler_params=pltpu.CompilerParams(
            dimension_semantics=("parallel",),
            vmem_limit_bytes=_vmem_limit_bytes(batch_block, S_enc, S_dec, D,
                                               heads, d_k, d_v, fused_params),
        ),
    )(x_encoder, x_decoder, *fused_params)


# ------------------------- pure-JAX reference -------------------------
def decoder_layer_ref(x_encoder, x_decoder, params, heads, d_k, d_v, eps=1e-5):
    (wq1, bq1, wk1, bk1, wv1, bv1, wo1, bo1, g1, be1,
     wq2, bq2, wk2, bk2, wv2, bv2, wo2, bo2, g2, be2,
     wf1, bf1, wf2, bf2, g3, be3) = params

    def ln(x, g, b):
        mu = jnp.mean(x, -1, keepdims=True)
        var = jnp.mean((x - mu) ** 2, -1, keepdims=True)
        return (x - mu) / jnp.sqrt(var + eps) * g + b

    def mha(xq, xkv, wq, bq, wk, bk, wv, bv, wo, bo, causal):
        B, Sq, D = xq.shape
        Sk = xkv.shape[1]
        q = (xq @ wq + bq).reshape(B, Sq, heads, d_k).transpose(0, 2, 1, 3)
        k = (xkv @ wk + bk).reshape(B, Sk, heads, d_k).transpose(0, 2, 1, 3)
        v = (xkv @ wv + bv).reshape(B, Sk, heads, d_v).transpose(0, 2, 1, 3)
        s = jnp.einsum("bhqd,bhkd->bhqk", q, k) / np.sqrt(d_k)
        if causal:
            m = jnp.tril(jnp.ones((Sq, Sk), bool))
            s = jnp.where(m[None, None], s, -1e9)
        p = jax.nn.softmax(s, -1)
        o = jnp.einsum("bhqk,bhkd->bhqd", p, v).transpose(0, 2, 1, 3).reshape(B, Sq, heads * d_v)
        return o @ wo + bo

    out1 = ln(x_decoder + mha(x_decoder, x_decoder, wq1, bq1, wk1, bk1, wv1, bv1, wo1, bo1, True), g1, be1)
    out2 = ln(out1 + mha(out1, x_encoder, wq2, bq2, wk2, bk2, wv2, bv2, wo2, bo2, False), g2, be2)
    ff = jnp.maximum(out2 @ wf1 + bf1, 0.0) @ wf2 + bf2
    return ln(out2 + ff, g3, be3)


if __name__ == "__main__":
    # small config consistent with the module's __init__ signature
    d_model, d_ff, heads, d_k, d_v = 32, 64, 4, 8, 8
    B, S_enc, S_dec = 2, 8, 8

    key = jax.random.PRNGKey(0)
    keys = jax.random.split(key, 32)

    def w(k, shape, fan_in):
        return (jax.random.normal(k, shape, jnp.float32) / np.sqrt(fan_in)).astype(jnp.float32)

    params = [
        # masked self-attention
        w(keys[0], (d_model, heads * d_k), d_model), jnp.zeros((heads * d_k,), jnp.float32),
        w(keys[1], (d_model, heads * d_k), d_model), jnp.zeros((heads * d_k,), jnp.float32),
        w(keys[2], (d_model, heads * d_v), d_model), jnp.zeros((heads * d_v,), jnp.float32),
        w(keys[3], (heads * d_v, d_model), heads * d_v), jnp.zeros((d_model,), jnp.float32),
        jnp.ones((d_model,), jnp.float32), jnp.zeros((d_model,), jnp.float32),   # norm1
        # cross-attention
        w(keys[4], (d_model, heads * d_k), d_model), jnp.zeros((heads * d_k,), jnp.float32),
        w(keys[5], (d_model, heads * d_k), d_model), jnp.zeros((heads * d_k,), jnp.float32),
        w(keys[6], (d_model, heads * d_v), d_model), jnp.zeros((heads * d_v,), jnp.float32),
        w(keys[7], (heads * d_v, d_model), heads * d_v), jnp.zeros((d_model,), jnp.float32),
        jnp.ones((d_model,), jnp.float32), jnp.zeros((d_model,), jnp.float32),   # norm2
        # feed-forward
        w(keys[8], (d_model, d_ff), d_model), jnp.zeros((d_ff,), jnp.float32),
        w(keys[9], (d_ff, d_model), d_ff), jnp.zeros((d_model,), jnp.float32),
        jnp.ones((d_model,), jnp.float32), jnp.zeros((d_model,), jnp.float32),   # norm3
    ]

    x_encoder = jax.random.normal(keys[10], (B, S_enc, d_model), jnp.float32)
    x_decoder = jax.random.normal(keys[11], (B, S_dec, d_model), jnp.float32)

    # default fast path: bf16 MXU operands, batch as a 2-step parallel grid
    out_fast = jax.block_until_ready(
        decoder_layer_pallas(x_encoder, x_decoder, params, heads, d_k, d_v))
    # high-precision path (f32 operands, exact reciprocal) for a tight check
    out_f32 = jax.block_until_ready(
        decoder_layer_pallas(x_encoder, x_decoder, params, heads, d_k, d_v,
                             compute_dtype=jnp.float32))

    ref = decoder_layer_ref(x_encoder, x_decoder, params, heads, d_k, d_v)
    np.testing.assert_allclose(np.asarray(out_f32), np.asarray(ref), atol=2e-4, rtol=2e-4)
    np.testing.assert_allclose(np.asarray(out_fast), np.asarray(ref), atol=5e-2, rtol=5e-2)

    print("KERNEL_OK")
</pallas_src>

<mosaic_0001>
module attributes {stable_mosaic.version = 11 : i64} {
  func.func @kernel(%arg0: i32, %arg1: memref<1x8x32xf32, #tpu.memory_space<vmem>>, %arg2: memref<1x8x32xf32, #tpu.memory_space<vmem>>, %arg3: memref<32x96xbf16, #tpu.memory_space<vmem>>, %arg4: memref<1x96xf32, #tpu.memory_space<vmem>>, %arg5: memref<32x32xbf16, #tpu.memory_space<vmem>>, %arg6: memref<1x32xf32, #tpu.memory_space<vmem>>, %arg7: memref<1x32xf32, #tpu.memory_space<vmem>>, %arg8: memref<1x32xf32, #tpu.memory_space<vmem>>, %arg9: memref<32x32xbf16, #tpu.memory_space<vmem>>, %arg10: memref<32x64xbf16, #tpu.memory_space<vmem>>, %arg11: memref<1x32xf32, #tpu.memory_space<vmem>>, %arg12: memref<1x64xf32, #tpu.memory_space<vmem>>, %arg13: memref<32x32xbf16, #tpu.memory_space<vmem>>, %arg14: memref<1x32xf32, #tpu.memory_space<vmem>>, %arg15: memref<1x32xf32, #tpu.memory_space<vmem>>, %arg16: memref<1x32xf32, #tpu.memory_space<vmem>>, %arg17: memref<32x64xbf16, #tpu.memory_space<vmem>>, %arg18: memref<1x64xf32, #tpu.memory_space<vmem>>, %arg19: memref<64x32xbf16, #tpu.memory_space<vmem>>, %arg20: memref<1x32xf32, #tpu.memory_space<vmem>>, %arg21: memref<1x32xf32, #tpu.memory_space<vmem>>, %arg22: memref<1x32xf32, #tpu.memory_space<vmem>>, %arg23: memref<1x8x32xf32, #tpu.memory_space<vmem>>) attributes {dimension_semantics = [#tpu.dimension_semantics<parallel>], iteration_bounds = array<i64: 2>, scalar_prefetch = 0 : i64, scratch_operands = 0 : i64, tpu.core_type = #tpu.core_type<tc>, window_params = [{transform_indices = @transform_0, window_bounds = array<i64: 1, 8, 32>}, {transform_indices = @transform_1, window_bounds = array<i64: 1, 8, 32>}, {pipeline_mode = #tpu.pipeline_mode<synchronous>, transform_indices = @transform_2, window_bounds = array<i64: 32, 96>}, {pipeline_mode = #tpu.pipeline_mode<synchronous>, transform_indices = @transform_3, window_bounds = array<i64: 1, 96>}, {pipeline_mode = #tpu.pipeline_mode<synchronous>, transform_indices = @transform_4, window_bounds = array<i64: 32, 32>}, {pipeline_mode = #tpu.pipeline_mode<synchronous>, transform_indices = @transform_5, window_bounds = array<i64: 1, 32>}, {pipeline_mode = #tpu.pipeline_mode<synchronous>, transform_indices = @transform_6, window_bounds = array<i64: 1, 32>}, {pipeline_mode = #tpu.pipeline_mode<synchronous>, transform_indices = @transform_7, window_bounds = array<i64: 1, 32>}, {pipeline_mode = #tpu.pipeline_mode<synchronous>, transform_indices = @transform_8, window_bounds = array<i64: 32, 32>}, {pipeline_mode = #tpu.pipeline_mode<synchronous>, transform_indices = @transform_9, window_bounds = array<i64: 32, 64>}, {pipeline_mode = #tpu.pipeline_mode<synchronous>, transform_indices = @transform_10, window_bounds = array<i64: 1, 32>}, {pipeline_mode = #tpu.pipeline_mode<synchronous>, transform_indices = @transform_11, window_bounds = array<i64: 1, 64>}, {pipeline_mode = #tpu.pipeline_mode<synchronous>, transform_indices = @transform_12, window_bounds = array<i64: 32, 32>}, {pipeline_mode = #tpu.pipeline_mode<synchronous>, transform_indices = @transform_13, window_bounds = array<i64: 1, 32>}, {pipeline_mode = #tpu.pipeline_mode<synchronous>, transform_indices = @transform_14, window_bounds = array<i64: 1, 32>}, {pipeline_mode = #tpu.pipeline_mode<synchronous>, transform_indices = @transform_15, window_bounds = array<i64: 1, 32>}, {pipeline_mode = #tpu.pipeline_mode<synchronous>, transform_indices = @transform_16, window_bounds = array<i64: 32, 64>}, {pipeline_mode = #tpu.pipeline_mode<synchronous>, transform_indices = @transform_17, window_bounds = array<i64: 1, 64>}, {pipeline_mode = #tpu.pipeline_mode<synchronous>, transform_indices = @transform_18, window_bounds = array<i64: 64, 32>}, {pipeline_mode = #tpu.pipeline_mode<synchronous>, transform_indices = @transform_19, window_bounds = array<i64: 1, 32>}, {pipeline_mode = #tpu.pipeline_mode<synchronous>, transform_indices = @transform_20, window_bounds = array<i64: 1, 32>}, {pipeline_mode = #tpu.pipeline_mode<synchronous>, transform_indices = @transform_21, window_bounds = array<i64: 1, 32>}, {transform_indices = @transform_22, window_bounds = array<i64: 1, 8, 32>}]} {
    %0 = tpu.iota {dimensions = array<i32: 0>} : vector<8x8xi32>
    %1 = tpu.iota {dimensions = array<i32: 1>} : vector<8x8xi32>
    %2 = arith.cmpi sgt, %1, %0 : vector<8x8xi32>
    %cst = arith.constant -1.000000e+09 : f32
    %cst_0 = arith.constant 0.000000e+00 : f32
    %3 = vector.broadcast %cst : f32 to vector<8x8xf32>
    %4 = vector.broadcast %cst_0 : f32 to vector<8x8xf32>
    %5 = arith.select %2, %3, %4 : vector<8x8xi1>, vector<8x8xf32>
    %c0 = arith.constant 0 : index
    %c0_1 = arith.constant 0 : index
    %c0_2 = arith.constant 0 : index
    %6 = vector.load %arg2[%c0, %c0_1, %c0_2] : memref<1x8x32xf32, #tpu.memory_space<vmem>>, vector<1x8x32xf32>
    %7 = vector.shape_cast %6 : vector<1x8x32xf32> to vector<8x32xf32>
    %c0_3 = arith.constant 0 : index
    %c0_4 = arith.constant 0 : index
    %c0_5 = arith.constant 0 : index
    %8 = vector.load %arg1[%c0_3, %c0_4, %c0_5] : memref<1x8x32xf32, #tpu.memory_space<vmem>>, vector<1x8x32xf32>
    %9 = vector.shape_cast %8 : vector<1x8x32xf32> to vector<8x32xf32>
    %10 = arith.truncf %7 : vector<8x32xf32> to vector<8x32xbf16>
    %c0_6 = arith.constant 0 : index
    %c0_7 = arith.constant 0 : index
    %11 = vector.load %arg3[%c0_6, %c0_7] : memref<32x96xbf16, #tpu.memory_space<vmem>>, vector<32x96xbf16>
    %cst_8 = arith.constant dense<0.000000e+00> : vector<8x96xf32>
    %12 = tpu.matmul %10, %11, %cst_8 {dimension_numbers = #tpu.dot_dimension_numbers<[1], [0], [0], [1], [0, 0, 1, 1], [], []>} : vector<8x32xbf16>, vector<32x96xbf16>, vector<8x96xf32> -> vector<8x96xf32>
    %c0_9 = arith.constant 0 : index
    %c0_10 = arith.constant 0 : index
    %13 = vector.load %arg4[%c0_9, %c0_10] : memref<1x96xf32, #tpu.memory_space<vmem>>, vector<1x96xf32>
    %14 = vector.broadcast %13 : vector<1x96xf32> to vector<8x96xf32>
    %15 = arith.addf %12, %14 : vector<8x96xf32>
    %16 = vector.extract_strided_slice %15 {offsets = [0, 0], sizes = [8, 32], strides = [1, 1]} : vector<8x96xf32> to vector<8x32xf32>
    %17 = vector.extract_strided_slice %15 {offsets = [0, 32], sizes = [8, 32], strides = [1, 1]} : vector<8x96xf32> to vector<8x32xf32>
    %18 = vector.extract_strided_slice %15 {offsets = [0, 64], sizes = [8, 32], strides = [1, 1]} : vector<8x96xf32> to vector<8x32xf32>
    %19 = vector.shape_cast %16 : vector<8x32xf32> to vector<8x4x8xf32>
    %20 = tpu.transpose %19, [1, 0, 2] : vector<8x4x8xf32> -> vector<4x8x8xf32>
    %21 = arith.truncf %20 : vector<4x8x8xf32> to vector<4x8x8xbf16>
    %22 = vector.shape_cast %17 : vector<8x32xf32> to vector<8x4x8xf32>
    %23 = tpu.transpose %22, [1, 0, 2] : vector<8x4x8xf32> -> vector<4x8x8xf32>
    %24 = arith.truncf %23 : vector<4x8x8xf32> to vector<4x8x8xbf16>
    %25 = vector.shape_cast %18 : vector<8x32xf32> to vector<8x4x8xf32>
    %26 = tpu.transpose %25, [1, 0, 2] : vector<8x4x8xf32> -> vector<4x8x8xf32>
    %27 = arith.truncf %26 : vector<4x8x8xf32> to vector<4x8x8xbf16>
    "tpu.trace_start"() <{level = 10 : i32, message = "gqd,gkd->gqk"}> : () -> ()
    %cst_11 = arith.constant dense<0.000000e+00> : vector<4x8x8xf32>
    %28 = tpu.matmul %21, %24, %cst_11 {dimension_numbers = #tpu.dot_dimension_numbers<[2], [2], [1], [1], [0, 0, 0, 1, 1, 1], [0], [0]>} : vector<4x8x8xbf16>, vector<4x8x8xbf16>, vector<4x8x8xf32> -> vector<4x8x8xf32>
    "tpu.trace_stop"() : () -> ()
    %29 = vector.shape_cast %5 : vector<8x8xf32> to vector<1x8x8xf32>
    %30 = vector.broadcast %29 : vector<1x8x8xf32> to vector<4x8x8xf32>
    %31 = arith.addf %28, %30 : vector<4x8x8xf32>
    %cst_12 = arith.constant dense<0xFF800000> : vector<4x8xf32>
    %32 = vector.multi_reduction <maximumf>, %31, %cst_12 [2] : vector<4x8x8xf32> to vector<4x8xf32>
    %33 = vector.shape_cast %32 : vector<4x8xf32> to vector<4x8x1xf32>
    %34 = vector.broadcast %33 : vector<4x8x1xf32> to vector<4x8x8xf32>
    %35 = arith.subf %31, %34 : vector<4x8x8xf32>
    %36 = math.exp %35 : vector<4x8x8xf32>
    %cst_13 = arith.constant dense<0.000000e+00> : vector<4x8xf32>
    %37 = vector.multi_reduction <add>, %36, %cst_13 [2] : vector<4x8x8xf32> to vector<4x8xf32>
    %38 = vector.shape_cast %37 : vector<4x8xf32> to vector<4x8x1xf32>
    %39 = tpu.reciprocal %38 {approx = true} : vector<4x8x1xf32> -> vector<4x8x1xf32>
    %40 = vector.broadcast %39 : vector<4x8x1xf32> to vector<4x8x8xf32>
    %41 = arith.mulf %36, %40 : vector<4x8x8xf32>
    %42 = arith.truncf %41 : vector<4x8x8xf32> to vector<4x8x8xbf16>
    "tpu.trace_start"() <{level = 10 : i32, message = "gqk,gkd->gqd"}> : () -> ()
    %cst_14 = arith.constant dense<0.000000e+00> : vector<4x8x8xf32>
    %43 = tpu.matmul %42, %27, %cst_14 {dimension_numbers = #tpu.dot_dimension_numbers<[2], [1], [1], [2], [0, 0, 0, 1, 1, 2], [0], [0]>} : vector<4x8x8xbf16>, vector<4x8x8xbf16>, vector<4x8x8xf32> -> vector<4x8x8xf32>
    "tpu.trace_stop"() : () -> ()
    %44 = tpu.transpose %43, [1, 0, 2] : vector<4x8x8xf32> -> vector<8x4x8xf32>
    %45 = vector.shape_cast %44 : vector<8x4x8xf32> to vector<8x32xf32>
    %46 = arith.truncf %45 : vector<8x32xf32> to vector<8x32xbf16>
    %c0_15 = arith.constant 0 : index
    %c0_16 = arith.constant 0 : index
    %47 = vector.load %arg5[%c0_15, %c0_16] : memref<32x32xbf16, #tpu.memory_space<vmem>>, vector<32x32xbf16>
    %cst_17 = arith.constant dense<0.000000e+00> : vector<8x32xf32>
    %48 = tpu.matmul %46, %47, %cst_17 {dimension_numbers = #tpu.dot_dimension_numbers<[1], [0], [0], [1], [0, 0, 1, 1], [], []>} : vector<8x32xbf16>, vector<32x32xbf16>, vector<8x32xf32> -> vector<8x32xf32>
    %c0_18 = arith.constant 0 : index
    %c0_19 = arith.constant 0 : index
    %49 = vector.load %arg6[%c0_18, %c0_19] : memref<1x32xf32, #tpu.memory_space<vmem>>, vector<1x32xf32>
    %50 = vector.broadcast %49 : vector<1x32xf32> to vector<8x32xf32>
    %51 = arith.addf %48, %50 : vector<8x32xf32>
    %52 = arith.addf %7, %51 : vector<8x32xf32>
    %cst_20 = arith.constant dense<0.000000e+00> : vector<8xf32>
    %53 = vector.multi_reduction <add>, %52, %cst_20 [1] : vector<8x32xf32> to vector<8xf32>
    %54 = vector.shape_cast %53 : vector<8xf32> to vector<8x1xf32>
    %cst_21 = arith.constant 3.200000e+01 : f32
    %55 = vector.broadcast %cst_21 : f32 to vector<8x1xf32>
    %56 = arith.divf %54, %55 : vector<8x1xf32>
    %57 = vector.broadcast %56 : vector<8x1xf32> to vector<8x32xf32>
    %58 = arith.subf %52, %57 : vector<8x32xf32>
    %59 = arith.mulf %58, %58 : vector<8x32xf32>
    %cst_22 = arith.constant dense<0.000000e+00> : vector<8xf32>
    %60 = vector.multi_reduction <add>, %59, %cst_22 [1] : vector<8x32xf32> to vector<8xf32>
    %61 = vector.shape_cast %60 : vector<8xf32> to vector<8x1xf32>
    %cst_23 = arith.constant 3.200000e+01 : f32
    %62 = vector.broadcast %cst_23 : f32 to vector<8x1xf32>
    %63 = arith.divf %61, %62 : vector<8x1xf32>
    %64 = vector.broadcast %56 : vector<8x1xf32> to vector<8x32xf32>
    %65 = arith.subf %52, %64 : vector<8x32xf32>
    %cst_24 = arith.constant 9.99999974E-6 : f32
    %66 = vector.broadcast %cst_24 : f32 to vector<8x1xf32>
    %67 = arith.addf %63, %66 : vector<8x1xf32>
    %68 = math.rsqrt %67 : vector<8x1xf32>
    %69 = vector.broadcast %68 : vector<8x1xf32> to vector<8x32xf32>
    %70 = arith.mulf %65, %69 : vector<8x32xf32>
    %c0_25 = arith.constant 0 : index
    %c0_26 = arith.constant 0 : index
    %71 = vector.load %arg7[%c0_25, %c0_26] : memref<1x32xf32, #tpu.memory_space<vmem>>, vector<1x32xf32>
    %72 = vector.broadcast %71 : vector<1x32xf32> to vector<8x32xf32>
    %73 = arith.mulf %70, %72 : vector<8x32xf32>
    %c0_27 = arith.constant 0 : index
    %c0_28 = arith.constant 0 : index
    %74 = vector.load %arg8[%c0_27, %c0_28] : memref<1x32xf32, #tpu.memory_space<vmem>>, vector<1x32xf32>
    %75 = vector.broadcast %74 : vector<1x32xf32> to vector<8x32xf32>
    %76 = arith.addf %73, %75 : vector<8x32xf32>
    %77 = arith.truncf %76 : vector<8x32xf32> to vector<8x32xbf16>
    %c0_29 = arith.constant 0 : index
    %c0_30 = arith.constant 0 : index
    %78 = vector.load %arg9[%c0_29, %c0_30] : memref<32x32xbf16, #tpu.memory_space<vmem>>, vector<32x32xbf16>
    %cst_31 = arith.constant dense<0.000000e+00> : vector<8x32xf32>
    %79 = tpu.matmul %77, %78, %cst_31 {dimension_numbers = #tpu.dot_dimension_numbers<[1], [0], [0], [1], [0, 0, 1, 1], [], []>} : vector<8x32xbf16>, vector<32x32xbf16>, vector<8x32xf32> -> vector<8x32xf32>
    %c0_32 = arith.constant 0 : index
    %c0_33 = arith.constant 0 : index
    %80 = vector.load %arg11[%c0_32, %c0_33] : memref<1x32xf32, #tpu.memory_space<vmem>>, vector<1x32xf32>
    %81 = vector.broadcast %80 : vector<1x32xf32> to vector<8x32xf32>
    %82 = arith.addf %79, %81 : vector<8x32xf32>
    %83 = arith.truncf %9 : vector<8x32xf32> to vector<8x32xbf16>
    %c0_34 = arith.constant 0 : index
    %c0_35 = arith.constant 0 : index
    %84 = vector.load %arg10[%c0_34, %c0_35] : memref<32x64xbf16, #tpu.memory_space<vmem>>, vector<32x64xbf16>
    %cst_36 = arith.constant dense<0.000000e+00> : vector<8x64xf32>
    %85 = tpu.matmul %83, %84, %cst_36 {dimension_numbers = #tpu.dot_dimension_numbers<[1], [0], [0], [1], [0, 0, 1, 1], [], []>} : vector<8x32xbf16>, vector<32x64xbf16>, vector<8x64xf32> -> vector<8x64xf32>
    %c0_37 = arith.constant 0 : index
    %c0_38 = arith.constant 0 : index
    %86 = vector.load %arg12[%c0_37, %c0_38] : memref<1x64xf32, #tpu.memory_space<vmem>>, vector<1x64xf32>
    %87 = vector.broadcast %86 : vector<1x64xf32> to vector<8x64xf32>
    %88 = arith.addf %85, %87 : vector<8x64xf32>
    %89 = vector.extract_strided_slice %88 {offsets = [0, 0], sizes = [8, 32], strides = [1, 1]} : vector<8x64xf32> to vector<8x32xf32>
    %90 = vector.extract_strided_slice %88 {offsets = [0, 32], sizes = [8, 32], strides = [1, 1]} : vector<8x64xf32> to vector<8x32xf32>
    %91 = vector.shape_cast %82 : vector<8x32xf32> to vector<8x4x8xf32>
    %92 = tpu.transpose %91, [1, 0, 2] : vector<8x4x8xf32> -> vector<4x8x8xf32>
    %93 = arith.truncf %92 : vector<4x8x8xf32> to vector<4x8x8xbf16>
    %94 = vector.shape_cast %89 : vector<8x32xf32> to vector<8x4x8xf32>
    %95 = tpu.transpose %94, [1, 0, 2] : vector<8x4x8xf32> -> vector<4x8x8xf32>
    %96 = arith.truncf %95 : vector<4x8x8xf32> to vector<4x8x8xbf16>
    %97 = vector.shape_cast %90 : vector<8x32xf32> to vector<8x4x8xf32>
    %98 = tpu.transpose %97, [1, 0, 2] : vector<8x4x8xf32> -> vector<4x8x8xf32>
    %99 = arith.truncf %98 : vector<4x8x8xf32> to vector<4x8x8xbf16>
    "tpu.trace_start"() <{level = 10 : i32, message = "gqd,gkd->gqk"}> : () -> ()
    %cst_39 = arith.constant dense<0.000000e+00> : vector<4x8x8xf32>
    %100 = tpu.matmul %93, %96, %cst_39 {dimension_numbers = #tpu.dot_dimension_numbers<[2], [2], [1], [1], [0, 0, 0, 1, 1, 1], [0], [0]>} : vector<4x8x8xbf16>, vector<4x8x8xbf16>, vector<4x8x8xf32> -> vector<4x8x8xf32>
    "tpu.trace_stop"() : () -> ()
    %cst_40 = arith.constant dense<0xFF800000> : vector<4x8xf32>
    %101 = vector.multi_reduction <maximumf>, %100, %cst_40 [2] : vector<4x8x8xf32> to vector<4x8xf32>
    %102 = vector.shape_cast %101 : vector<4x8xf32> to vector<4x8x1xf32>
    %103 = vector.broadcast %102 : vector<4x8x1xf32> to vector<4x8x8xf32>
    %104 = arith.subf %100, %103 : vector<4x8x8xf32>
    %105 = math.exp %104 : vector<4x8x8xf32>
    %cst_41 = arith.constant dense<0.000000e+00> : vector<4x8xf32>
    %106 = vector.multi_reduction <add>, %105, %cst_41 [2] : vector<4x8x8xf32> to vector<4x8xf32>
    %107 = vector.shape_cast %106 : vector<4x8xf32> to vector<4x8x1xf32>
    %108 = tpu.reciprocal %107 {approx = true} : vector<4x8x1xf32> -> vector<4x8x1xf32>
    %109 = vector.broadcast %108 : vector<4x8x1xf32> to vector<4x8x8xf32>
    %110 = arith.mulf %105, %109 : vector<4x8x8xf32>
    %111 = arith.truncf %110 : vector<4x8x8xf32> to vector<4x8x8xbf16>
    "tpu.trace_start"() <{level = 10 : i32, message = "gqk,gkd->gqd"}> : () -> ()
    %cst_42 = arith.constant dense<0.000000e+00> : vector<4x8x8xf32>
    %112 = tpu.matmul %111, %99, %cst_42 {dimension_numbers = #tpu.dot_dimension_numbers<[2], [1], [1], [2], [0, 0, 0, 1, 1, 2], [0], [0]>} : vector<4x8x8xbf16>, vector<4x8x8xbf16>, vector<4x8x8xf32> -> vector<4x8x8xf32>
    "tpu.trace_stop"() : () -> ()
    %113 = tpu.transpose %112, [1, 0, 2] : vector<4x8x8xf32> -> vector<8x4x8xf32>
    %114 = vector.shape_cast %113 : vector<8x4x8xf32> to vector<8x32xf32>
    %115 = arith.truncf %114 : vector<8x32xf32> to vector<8x32xbf16>
    %c0_43 = arith.constant 0 : index
    %c0_44 = arith.constant 0 : index
    %116 = vector.load %arg13[%c0_43, %c0_44] : memref<32x32xbf16, #tpu.memory_space<vmem>>, vector<32x32xbf16>
    %cst_45 = arith.constant dense<0.000000e+00> : vector<8x32xf32>
    %117 = tpu.matmul %115, %116, %cst_45 {dimension_numbers = #tpu.dot_dimension_numbers<[1], [0], [0], [1], [0, 0, 1, 1], [], []>} : vector<8x32xbf16>, vector<32x32xbf16>, vector<8x32xf32> -> vector<8x32xf32>
    %c0_46 = arith.constant 0 : index
    %c0_47 = arith.constant 0 : index
    %118 = vector.load %arg14[%c0_46, %c0_47] : memref<1x32xf32, #tpu.memory_space<vmem>>, vector<1x32xf32>
    %119 = vector.broadcast %118 : vector<1x32xf32> to vector<8x32xf32>
    %120 = arith.addf %117, %119 : vector<8x32xf32>
    %121 = arith.addf %76, %120 : vector<8x32xf32>
    %cst_48 = arith.constant dense<0.000000e+00> : vector<8xf32>
    %122 = vector.multi_reduction <add>, %121, %cst_48 [1] : vector<8x32xf32> to vector<8xf32>
    %123 = vector.shape_cast %122 : vector<8xf32> to vector<8x1xf32>
    %cst_49 = arith.constant 3.200000e+01 : f32
    %124 = vector.broadcast %cst_49 : f32 to vector<8x1xf32>
    %125 = arith.divf %123, %124 : vector<8x1xf32>
    %126 = vector.broadcast %125 : vector<8x1xf32> to vector<8x32xf32>
    %127 = arith.subf %121, %126 : vector<8x32xf32>
    %128 = arith.mulf %127, %127 : vector<8x32xf32>
    %cst_50 = arith.constant dense<0.000000e+00> : vector<8xf32>
    %129 = vector.multi_reduction <add>, %128, %cst_50 [1] : vector<8x32xf32> to vector<8xf32>
    %130 = vector.shape_cast %129 : vector<8xf32> to vector<8x1xf32>
    %cst_51 = arith.constant 3.200000e+01 : f32
    %131 = vector.broadcast %cst_51 : f32 to vector<8x1xf32>
    %132 = arith.divf %130, %131 : vector<8x1xf32>
    %133 = vector.broadcast %125 : vector<8x1xf32> to vector<8x32xf32>
    %134 = arith.subf %121, %133 : vector<8x32xf32>
    %cst_52 = arith.constant 9.99999974E-6 : f32
    %135 = vector.broadcast %cst_52 : f32 to vector<8x1xf32>
    %136 = arith.addf %132, %135 : vector<8x1xf32>
    %137 = math.rsqrt %136 : vector<8x1xf32>
    %138 = vector.broadcast %137 : vector<8x1xf32> to vector<8x32xf32>
    %139 = arith.mulf %134, %138 : vector<8x32xf32>
    %c0_53 = arith.constant 0 : index
    %c0_54 = arith.constant 0 : index
    %140 = vector.load %arg15[%c0_53, %c0_54] : memref<1x32xf32, #tpu.memory_space<vmem>>, vector<1x32xf32>
    %141 = vector.broadcast %140 : vector<1x32xf32> to vector<8x32xf32>
    %142 = arith.mulf %139, %141 : vector<8x32xf32>
    %c0_55 = arith.constant 0 : index
    %c0_56 = arith.constant 0 : index
    %143 = vector.load %arg16[%c0_55, %c0_56] : memref<1x32xf32, #tpu.memory_space<vmem>>, vector<1x32xf32>
    %144 = vector.broadcast %143 : vector<1x32xf32> to vector<8x32xf32>
    %145 = arith.addf %142, %144 : vector<8x32xf32>
    %146 = arith.truncf %145 : vector<8x32xf32> to vector<8x32xbf16>
    %c0_57 = arith.constant 0 : index
    %c0_58 = arith.constant 0 : index
    %147 = vector.load %arg17[%c0_57, %c0_58] : memref<32x64xbf16, #tpu.memory_space<vmem>>, vector<32x64xbf16>
    %cst_59 = arith.constant dense<0.000000e+00> : vector<8x64xf32>
    %148 = tpu.matmul %146, %147, %cst_59 {dimension_numbers = #tpu.dot_dimension_numbers<[1], [0], [0], [1], [0, 0, 1, 1], [], []>} : vector<8x32xbf16>, vector<32x64xbf16>, vector<8x64xf32> -> vector<8x64xf32>
    %c0_60 = arith.constant 0 : index
    %c0_61 = arith.constant 0 : index
    %149 = vector.load %arg18[%c0_60, %c0_61] : memref<1x64xf32, #tpu.memory_space<vmem>>, vector<1x64xf32>
    %150 = vector.broadcast %149 : vector<1x64xf32> to vector<8x64xf32>
    %151 = arith.addf %148, %150 : vector<8x64xf32>
    %cst_62 = arith.constant 0.000000e+00 : f32
    %152 = vector.broadcast %cst_62 : f32 to vector<8x64xf32>
    %153 = arith.maximumf %151, %152 : vector<8x64xf32>
    %154 = arith.truncf %153 : vector<8x64xf32> to vector<8x64xbf16>
    %c0_63 = arith.constant 0 : index
    %c0_64 = arith.constant 0 : index
    %155 = vector.load %arg19[%c0_63, %c0_64] : memref<64x32xbf16, #tpu.memory_space<vmem>>, vector<64x32xbf16>
    %cst_65 = arith.constant dense<0.000000e+00> : vector<8x32xf32>
    %156 = tpu.matmul %154, %155, %cst_65 {dimension_numbers = #tpu.dot_dimension_numbers<[1], [0], [0], [1], [0, 0, 1, 1], [], []>} : vector<8x64xbf16>, vector<64x32xbf16>, vector<8x32xf32> -> vector<8x32xf32>
    %c0_66 = arith.constant 0 : index
    %c0_67 = arith.constant 0 : index
    %157 = vector.load %arg20[%c0_66, %c0_67] : memref<1x32xf32, #tpu.memory_space<vmem>>, vector<1x32xf32>
    %158 = vector.broadcast %157 : vector<1x32xf32> to vector<8x32xf32>
    %159 = arith.addf %156, %158 : vector<8x32xf32>
    %160 = arith.addf %145, %159 : vector<8x32xf32>
    %cst_68 = arith.constant dense<0.000000e+00> : vector<8xf32>
    %161 = vector.multi_reduction <add>, %160, %cst_68 [1] : vector<8x32xf32> to vector<8xf32>
    %162 = vector.shape_cast %161 : vector<8xf32> to vector<8x1xf32>
    %cst_69 = arith.constant 3.200000e+01 : f32
    %163 = vector.broadcast %cst_69 : f32 to vector<8x1xf32>
    %164 = arith.divf %162, %163 : vector<8x1xf32>
    %165 = vector.broadcast %164 : vector<8x1xf32> to vector<8x32xf32>
    %166 = arith.subf %160, %165 : vector<8x32xf32>
    %167 = arith.mulf %166, %166 : vector<8x32xf32>
    %cst_70 = arith.constant dense<0.000000e+00> : vector<8xf32>
    %168 = vector.multi_reduction <add>, %167, %cst_70 [1] : vector<8x32xf32> to vector<8xf32>
    %169 = vector.shape_cast %168 : vector<8xf32> to vector<8x1xf32>
    %cst_71 = arith.constant 3.200000e+01 : f32
    %170 = vector.broadcast %cst_71 : f32 to vector<8x1xf32>
    %171 = arith.divf %169, %170 : vector<8x1xf32>
    %172 = vector.broadcast %164 : vector<8x1xf32> to vector<8x32xf32>
    %173 = arith.subf %160, %172 : vector<8x32xf32>
    %cst_72 = arith.constant 9.99999974E-6 : f32
    %174 = vector.broadcast %cst_72 : f32 to vector<8x1xf32>
    %175 = arith.addf %171, %174 : vector<8x1xf32>
    %176 = math.rsqrt %175 : vector<8x1xf32>
    %177 = vector.broadcast %176 : vector<8x1xf32> to vector<8x32xf32>
    %178 = arith.mulf %173, %177 : vector<8x32xf32>
    %c0_73 = arith.constant 0 : index
    %c0_74 = arith.constant 0 : index
    %179 = vector.load %arg21[%c0_73, %c0_74] : memref<1x32xf32, #tpu.memory_space<vmem>>, vector<1x32xf32>
    %180 = vector.broadcast %179 : vector<1x32xf32> to vector<8x32xf32>
    %181 = arith.mulf %178, %180 : vector<8x32xf32>
    %c0_75 = arith.constant 0 : index
    %c0_76 = arith.constant 0 : index
    %182 = vector.load %arg22[%c0_75, %c0_76] : memref<1x32xf32, #tpu.memory_space<vmem>>, vector<1x32xf32>
    %183 = vector.broadcast %182 : vector<1x32xf32> to vector<8x32xf32>
    %184 = arith.addf %181, %183 : vector<8x32xf32>
    %185 = vector.shape_cast %184 : vector<8x32xf32> to vector<1x8x32xf32>
    %c0_77 = arith.constant 0 : index
    %c0_78 = arith.constant 0 : index
    %c0_79 = arith.constant 0 : index
    %186 = vector.load %arg23[%c0_77, %c0_78, %c0_79] : memref<1x8x32xf32, #tpu.memory_space<vmem>>, vector<1x8x32xf32>
    tpu.vector_store %arg23[%c0_77, %c0_78, %c0_79], %185 {strides = array<i32>} : memref<1x8x32xf32, #tpu.memory_space<vmem>>, vector<1x8x32xf32>,
    return
  }
  func.func @transform_0(%arg0: i32) -> (i32, i32, i32) {
    %c0_i32 = arith.constant 0 : i32
    %c0_i32_0 = arith.constant 0 : i32
    %c0_i32_1 = arith.constant 0 : i32
    return %arg0, %c0_i32, %c0_i32_0 : i32, i32, i32
  }
  func.func @transform_1(%arg0: i32) -> (i32, i32, i32) {
    %c0_i32 = arith.constant 0 : i32
    %c0_i32_0 = arith.constant 0 : i32
    %c0_i32_1 = arith.constant 0 : i32
    return %arg0, %c0_i32, %c0_i32_0 : i32, i32, i32
  }
  func.func @transform_2(%arg0: i32) -> (i32, i32) {
    %c0_i32 = arith.constant 0 : i32
    %c0_i32_0 = arith.constant 0 : i32
    %c0_i32_1 = arith.constant 0 : i32
    return %c0_i32, %c0_i32_0 : i32, i32
  }
  func.func @transform_3(%arg0: i32) -> (i32, i32) {
    %c0_i32 = arith.constant 0 : i32
    %c0_i32_0 = arith.constant 0 : i32
    %c0_i32_1 = arith.constant 0 : i32
    return %c0_i32, %c0_i32_0 : i32, i32
  }
  func.func @transform_4(%arg0: i32) -> (i32, i32) {
    %c0_i32 = arith.constant 0 : i32
    %c0_i32_0 = arith.constant 0 : i32
    %c0_i32_1 = arith.constant 0 : i32
    return %c0_i32, %c0_i32_0 : i32, i32
  }
  func.func @transform_5(%arg0: i32) -> (i32, i32) {
    %c0_i32 = arith.constant 0 : i32
    %c0_i32_0 = arith.constant 0 : i32
    %c0_i32_1 = arith.constant 0 : i32
    return %c0_i32, %c0_i32_0 : i32, i32
  }
  func.func @transform_6(%arg0: i32) -> (i32, i32) {
    %c0_i32 = arith.constant 0 : i32
    %c0_i32_0 = arith.constant 0 : i32
    %c0_i32_1 = arith.constant 0 : i32
    return %c0_i32, %c0_i32_0 : i32, i32
  }
  func.func @transform_7(%arg0: i32) -> (i32, i32) {
    %c0_i32 = arith.constant 0 : i32
    %c0_i32_0 = arith.constant 0 : i32
    %c0_i32_1 = arith.constant 0 : i32
    return %c0_i32, %c0_i32_0 : i32, i32
  }
  func.func @transform_8(%arg0: i32) -> (i32, i32) {
    %c0_i32 = arith.constant 0 : i32
    %c0_i32_0 = arith.constant 0 : i32
    %c0_i32_1 = arith.constant 0 : i32
    return %c0_i32, %c0_i32_0 : i32, i32
  }
  func.func @transform_9(%arg0: i32) -> (i32, i32) {
    %c0_i32 = arith.constant 0 : i32
    %c0_i32_0 = arith.constant 0 : i32
    %c0_i32_1 = arith.constant 0 : i32
    return %c0_i32, %c0_i32_0 : i32, i32
  }
  func.func @transform_10(%arg0: i32) -> (i32, i32) {
    %c0_i32 = arith.constant 0 : i32
    %c0_i32_0 = arith.constant 0 : i32
    %c0_i32_1 = arith.constant 0 : i32
    return %c0_i32, %c0_i32_0 : i32, i32
  }
  func.func @transform_11(%arg0: i32) -> (i32, i32) {
    %c0_i32 = arith.constant 0 : i32
    %c0_i32_0 = arith.constant 0 : i32
    %c0_i32_1 = arith.constant 0 : i32
    return %c0_i32, %c0_i32_0 : i32, i32
  }
  func.func @transform_12(%arg0: i32) -> (i32, i32) {
    %c0_i32 = arith.constant 0 : i32
    %c0_i32_0 = arith.constant 0 : i32
    %c0_i32_1 = arith.constant 0 : i32
    return %c0_i32, %c0_i32_0 : i32, i32
  }
  func.func @transform_13(%arg0: i32) -> (i32, i32) {
    %c0_i32 = arith.constant 0 : i32
    %c0_i32_0 = arith.constant 0 : i32
    %c0_i32_1 = arith.constant 0 : i32
    return %c0_i32, %c0_i32_0 : i32, i32
  }
  func.func @transform_14(%arg0: i32) -> (i32, i32) {
    %c0_i32 = arith.constant 0 : i32
    %c0_i32_0 = arith.constant 0 : i32
    %c0_i32_1 = arith.constant 0 : i32
    return %c0_i32, %c0_i32_0 : i32, i32
  }
  func.func @transform_15(%arg0: i32) -> (i32, i32) {
    %c0_i32 = arith.constant 0 : i32
    %c0_i32_0 = arith.constant 0 : i32
    %c0_i32_1 = arith.constant 0 : i32
    return %c0_i32, %c0_i32_0 : i32, i32
  }
  func.func @transform_16(%arg0: i32) -> (i32, i32) {
    %c0_i32 = arith.constant 0 : i32
    %c0_i32_0 = arith.constant 0 : i32
    %c0_i32_1 = arith.constant 0 : i32
    return %c0_i32, %c0_i32_0 : i32, i32
  }
  func.func @transform_17(%arg0: i32) -> (i32, i32) {
    %c0_i32 = arith.constant 0 : i32
    %c0_i32_0 = arith.constant 0 : i32
    %c0_i32_1 = arith.constant 0 : i32
    return %c0_i32, %c0_i32_0 : i32, i32
  }
  func.func @transform_18(%arg0: i32) -> (i32, i32) {
    %c0_i32 = arith.constant 0 : i32
    %c0_i32_0 = arith.constant 0 : i32
    %c0_i32_1 = arith.constant 0 : i32
    return %c0_i32, %c0_i32_0 : i32, i32
  }
  func.func @transform_19(%arg0: i32) -> (i32, i32) {
    %c0_i32 = arith.constant 0 : i32
    %c0_i32_0 = arith.constant 0 : i32
    %c0_i32_1 = arith.constant 0 : i32
    return %c0_i32, %c0_i32_0 : i32, i32
  }
  func.func @transform_20(%arg0: i32) -> (i32, i32) {
    %c0_i32 = arith.constant 0 : i32
    %c0_i32_0 = arith.constant 0 : i32
    %c0_i32_1 = arith.constant 0 : i32
    return %c0_i32, %c0_i32_0 : i32, i32
  }
  func.func @transform_21(%arg0: i32) -> (i32, i32) {
    %c0_i32 = arith.constant 0 : i32
    %c0_i32_0 = arith.constant 0 : i32
    %c0_i32_1 = arith.constant 0 : i32
    return %c0_i32, %c0_i32_0 : i32, i32
  }
  func.func @transform_22(%arg0: i32) -> (i32, i32, i32) {
    %c0_i32 = arith.constant 0 : i32
    %c0_i32_0 = arith.constant 0 : i32
    %c0_i32_1 = arith.constant 0 : i32
    return %arg0, %c0_i32, %c0_i32_0 : i32, i32, i32
  }
}

</mosaic_0001>

<bundles_post_ra>
// kernel: tpu_custom_call.1
= control target key start
LH: loop header
LB: loop body
LE: loop exit
PB: predicated region body
PF: predicated region fallthrough
CT: control target
= control target key end

     0   :  { %s5399_s0 = inlined_call_operand.vmem [shape: f32[2,8,32], index: 0, kind: input, shape index: {}]   ;;  %s5400_s1 = inlined_call_operand.vmem [shape: f32[2,8,32], index: 1, kind: input, shape index: {}]   ;;  %s5401_s2 = inlined_call_operand.vmem [shape: bf16[32,96], index: 2, kind: input, shape index: {}]   ;;  %s5402_s3 = inlined_call_operand.vmem [shape: f32[1,96], index: 3, kind: input, shape index: {}]   ;;  %s5403_s4 = inlined_call_operand.hbm [shape: bf16[32,32], index: 4, kind: input, shape index: {}]   ;;  %s5404_s5 = inlined_call_operand.hbm [shape: f32[1,32], index: 5, kind: input, shape index: {}]   ;;  %s5405_s6 = inlined_call_operand.hbm [shape: f32[1,32], index: 6, kind: input, shape index: {}]   ;;  %s5406_s7 = inlined_call_operand.hbm [shape: f32[1,32], index: 7, kind: input, shape index: {}]   ;;  %s5407_s8 = inlined_call_operand.hbm [shape: bf16[32,32], index: 8, kind: input, shape index: {}]   ;;  %s5408_s9 = inlined_call_operand.vmem [shape: bf16[32,64], index: 9, kind: input, shape index: {}]   ;;  %s5409_s10 = inlined_call_operand.hbm [shape: f32[1,32], index: 10, kind: input, shape index: {}]   ;;  %s5410_s11 = inlined_call_operand.hbm [shape: f32[1,64], index: 11, kind: input, shape index: {}]   ;;  %s5411_s12 = inlined_call_operand.hbm [shape: bf16[32,32], index: 12, kind: input, shape index: {}]   ;;  %s5412_s13 = inlined_call_operand.hbm [shape: f32[1,32], index: 13, kind: input, shape index: {}]   ;;  %s5413_s14 = inlined_call_operand.vmem [shape: f32[1,32], index: 14, kind: input, shape index: {}]   ;;  %s5414_s15 = inlined_call_operand.vmem [shape: f32[1,32], index: 15, kind: input, shape index: {}]   ;;  %s5415_s16 = inlined_call_operand.vmem [shape: bf16[32,64], index: 16, kind: input, shape index: {}]   ;;  %s5416_s17 = inlined_call_operand.vmem [shape: f32[1,64], index: 17, kind: input, shape index: {}]   ;;  %s5417_s18 = inlined_call_operand.vmem [shape: bf16[64,32], index: 18, kind: input, shape index: {}]   ;;  %s5418_s19 = inlined_call_operand.vmem [shape: f32[1,32], index: 19, kind: input, shape index: {}]   ;;  %s5419_s20 = inlined_call_operand.vmem [shape: f32[1,32], index: 20, kind: input, shape index: {}]   ;;  %s5420_s21 = inlined_call_operand.vmem [shape: f32[1,32], index: 21, kind: input, shape index: {}]   ;;  %s5421_s22 = inlined_call_operand.hbm [shape: f32[2,8,32], index: 22, kind: output, shape index: {}]  }
   0x1   :  { %5440 = sst [smem:[#allocation32_spill]] %s5399_s0 }
   0x2   :  { %5441 = sst [smem:[#allocation33_spill]] %s5400_s1 }
   0x3   :  { %5442 = sst [smem:[#allocation34_spill]] %s5401_s2 }
   0x4   :  { %5443 = sst [smem:[#allocation35_spill]] %s5402_s3 }
   0x5   :  { %5444 = sst [smem:[#allocation36_spill]] %s5403_s4 }
   0x6   :  { %5445 = sst [smem:[#allocation37_spill]] %s5404_s5 }
   0x7   :  { %5446 = sst [smem:[#allocation38_spill]] %s5405_s6 }
   0x8   :  { %5447 = sst [smem:[#allocation39_spill]] %s5406_s7 }
   0x9   :  { %5448 = sst [smem:[#allocation40_spill]] %s5409_s10 }
   0xa   :  { %5449 = sst [smem:[#allocation41_spill]] %s5411_s12 }
   0xb   :  { %5450 = sst [smem:[#allocation42_spill]] %s5418_s19 }
   0xc   :  { %5451 = sst [smem:[#allocation43_spill]] %s5419_s20 }
   0xd   :  { %5452 = sst [smem:[#allocation44_spill]] %s5420_s21 }
   0xe   :  { %5453 = sst [smem:[#allocation45_spill]] %s5421_s22 }
   0xf   :  { %27 = vsyncpa [#allocation3], 0 }
  0x10   :  { %28 = vsyncpa [#allocation6], 0 }
  0x11   :  { %29 = vsyncpa [#allocation9], 0 }
  0x12   :  { %30 = vsyncpa [#allocation12], 0 }
  0x13   :  { %31 = vsyncpa [#allocation15], 0 }
  0x14   :  { %32 = vsyncpa [#allocation4], 0 }
  0x15   :  { %34 = vsyncpa [#allocation4 + $0x1], 0  ;;  %s4602_s3 = smov 0   ;;  %s4604_s28 = smov 0  }
  0x16   :  { %s4606_s29 = smov 0   ;;  %s4608_s30 = smov 0  }
  0x17 LB: > { %5454 = sst [smem:[#allocation24_spill]] %s4449_s3  ;;  %s4623_s4 = sadd.s32 4294967295, %s4461_s30   ;;  %s4461_s30 = sphi %s4608_s30, %s5500_s30   ;;  %s4457_s29 = sphi %s4606_s29, %s5503_s29   ;;  %s4453_s28 = sphi %s4604_s28, %s5502_s28   ;;  %s4449_s3 = sphi %s4602_s3, %s5501_s3  }
  0x18   : > { %5455 = sst [smem:[#allocation25_spill]] %s4453_s28  ;;  %s3621_s0 = sadd.s32 4294967294, %s4461_s30  }
  0x19   : > { %5456 = sst [smem:[#allocation26_spill]] %s4457_s29  ;;  %s4627_s23 = sadd.s32 1, %s4461_s30  }
  0x1a   : > { %5457 = sst [smem:[#allocation27_spill]] %s4461_s30  ;;  %s519_s1 = sadd.s32 1, %s4457_s29 }
  0x1b   : > { %5458 = sst [smem:[#allocation28_spill]] %s4627_s23  ;;  %s516_s5 = ssub.s32 %s4461_s30, %s4627_s23 }
  0x1c   : > { %p529_p0 = scmp.ne.s32.totalorder %s4457_s29, %s4453_s28  ;;  %p517_p1 = scmp.eq.s32.totalorder %s516_s5, 0 }
  0x1d   : > { %p530_p2 = scmp.eq.s32.totalorder %s4623_s4, 1  ;;  %p535_p3 = scmp.ne.s32.totalorder %s4453_s28, %s4449_s3 }
  0x1e   : > { %p536_p4 = scmp.eq.s32.totalorder %s3621_s0, 1  ;;  %p3622_p7 = scmp.ge.s32.totalorder %s4461_s30, 1 }
  0x1f   : > { %s4638_s24 = scalar_select %p517_p1, %s4457_s29, %s519_s1  }
  0x20   : > { %p4640_p5 = por %p530_p2, %p529_p0  ;;  %p4644_p6 = por %p536_p4, %p535_p3 }
  0x21   : > { %5459 = sst [smem:[#allocation29_spill]] %s4638_s24  ;;  %p543_p8 = scmp.lt.s32.totalorder %s4461_s30, 3 }
  0x22   : > { %s5460_s6 = scalar_select %p4640_p5, 1, 0 }
  0x23   : > { %s5462_s25 = scalar_select %p4644_p6, 1, 0 }
  0x24   : > { %5461 = sst [smem:[#allocation30_spill]] %s5460_s6  ;;  %p5433_p9 = scmp.eq.s32.totalorder %s4623_s4, 0 }
  0x25   : > { %5463 = sst [smem:[#allocation31_spill]] %s5462_s25  ;;  %p4651_p10 = pnand %p3622_p7, %p543_p8 }
  0x26   : > { %s4463_s2 = smov [#allocation5]   ;;  %s4464_s0 = smov [#allocation8]  }
  0x27   : > { %s5464_s26 = scalar_select %p4651_p10, 1, 0 }
  0x28   : > { %s575_s27 = sshll.u32 %s4463_s2, 4  ;;  %p3967_p11 = pneg %p4651_p10  ;;  %s576_s27 = int_to_ptr.vmem [resolvable:$true] %s575_s27 }
  0x29   : > { %s597_s1 = sshll.u32 %s4464_s0, 4  ;;  %s4465_s24 = smov [#allocation11]   ;;  %s4663_s1 = int_to_ptr.vmem [resolvable:$true] %s597_s1 }
  0x2a   : > { %p4659_p12 = pnand %p5433_p9, %p3967_p11  ;;  %s624_s29 = sshll.u32 %s4465_s24, 4  ;;  %s4665_s29 = int_to_ptr.vmem [resolvable:$true] %s624_s29 }
  0x2b   : > { %s5466_s2 = sld [smem:[#allocation37_spill]] }
  0x2c   : > { %p4675_p0 = pneg %p4659_p12 }
  0x31   : > { %s4127_s3 = scalar_lea.hbm %s5466_s2, 16 }
  0x32   : > { %p4128_p13 = scmp.ne.s32.totalorder %s5466_s2, %s4127_s3  ;;  %p4134_p3 = scmp.lt.u32.totalorder %s4127_s3, %s5466_s2 }
  0x34   : > { %p4130_p1 = pnand %p4675_p0, %p4128_p13 }
  0x36   : > { %p4131_p2 = pneg %p4130_p1 }
  0x38   : > { %p4136_p4 = pnand %p4134_p3, %p4131_p2 }
  0x3a   : > { %4139 = shalt.err (!%p4136_p4)
}
  0x3b   : > { %s4140_s23 = scalar_lea.vmem %s576_s27, 16  ;;  %s4147_s22 = scalar_lea.vmem %s576_s27, 32 }
  0x3c   : > { %p4141_p7 = scmp.ne.s32.totalorder %s576_s27, %s4140_s23  ;;  %p4148_p9 = scmp.lt.s32.totalorder %s576_s27, %s576_s27 }
  0x3d   : > { %p4149_p6 = scmp.lt.s32.totalorder %s4147_s22, %s4140_s23 }
  0x3e   : > { %p4143_p8 = pnand %p4141_p7, %p4675_p0 }
  0x3f   : > { %p4150_p5 = por %p4149_p6, %p4148_p9 }
  0x40   : > { %p4144_p11 = pneg %p4143_p8 }
  0x42   : > { %p4151_p10 = pnand %p4150_p5, %p4144_p11 }
  0x44   : > { %4154 = shalt.err (!%p4151_p10)
}
  0x45   : > { %3973 = dma.hbm_to_vmem [thread:$0]  (!%p4659_p12), %s5466_s2, 16, %s576_s27, [#allocation6]  }
  0x46   : > { %s5468_s7 = sld [smem:[#allocation39_spill]] }
  0x4c   : > { %s4155_s24 = scalar_lea.hbm %s5468_s7, 16 }
  0x4d   : > { %p4156_p13 = scmp.ne.s32.totalorder %s5468_s7, %s4155_s24  ;;  %p4162_p5 = scmp.lt.u32.totalorder %s4155_s24, %s5468_s7 }
  0x4f   : > { %p4158_p1 = pnand %p4156_p13, %p4675_p0 }
  0x51   : > { %p4159_p6 = pneg %p4158_p1 }
  0x53   : > { %p4164_p9 = pnand %p4162_p5, %p4159_p6 }
  0x55   : > { %4167 = shalt.err (!%p4164_p9)
}
  0x56   : > { %s4168_s27 = scalar_lea.vmem %s4663_s1, 16  ;;  %s4175_s20 = scalar_lea.vmem %s4663_s1, 32 }
  0x57   : > { %p4169_p10 = scmp.ne.s32.totalorder %s4663_s1, %s4168_s27  ;;  %p4176_p4 = scmp.lt.s32.totalorder %s4663_s1, %s4663_s1 }
  0x58   : > { %p4177_p7 = scmp.lt.s32.totalorder %s4175_s20, %s4168_s27 }
  0x59   : > { %p4171_p2 = pnand %p4169_p10, %p4675_p0 }
  0x5a   : > { %p4178_p8 = por %p4177_p7, %p4176_p4 }
  0x5b   : > { %p4172_p3 = pneg %p4171_p2 }
  0x5d   : > { %p4179_p11 = pnand %p4178_p8, %p4172_p3 }
  0x5f   : > { %4182 = shalt.err (!%p4179_p11)
}
  0x60   : > { %3979 = dma.hbm_to_vmem [thread:$0]  (!%p4659_p12), %s5468_s7, 16, %s4663_s1, [#allocation9]  }
  0x61   : > { %s5469_s10 = sld [smem:[#allocation40_spill]] }
  0x67   : > { %s4183_s3 = scalar_lea.hbm %s5469_s10, 16 }
  0x68   : > { %p4184_p13 = scmp.ne.s32.totalorder %s5469_s10, %s4183_s3  ;;  %p4190_p5 = scmp.lt.u32.totalorder %s4183_s3, %s5469_s10 }
  0x6a   : > { %p4186_p1 = pnand %p4184_p13, %p4675_p0 }
  0x6c   : > { %p4187_p6 = pneg %p4186_p1 }
  0x6e   : > { %p4192_p9 = pnand %p4190_p5, %p4187_p6 }
  0x70   : > { %4195 = shalt.err (!%p4192_p9)
}
  0x71   : > { %s4196_s1 = scalar_lea.vmem %s4665_s29, 16  ;;  %s4203_s20 = scalar_lea.vmem %s4665_s29, 32 }
  0x72   : > { %p4197_p10 = scmp.ne.s32.totalorder %s4665_s29, %s4196_s1  ;;  %p4204_p4 = scmp.lt.s32.totalorder %s4665_s29, %s4665_s29 }
  0x73   : > { %p4205_p7 = scmp.lt.s32.totalorder %s4203_s20, %s4196_s1 }
  0x74   : > { %p4199_p2 = pnand %p4197_p10, %p4675_p0 }
  0x75   : > { %p4206_p8 = por %p4205_p7, %p4204_p4 }
  0x76   : > { %p4200_p3 = pneg %p4199_p2 }
  0x78   : > { %p4207_p11 = pnand %p4206_p8, %p4200_p3 }
  0x7a   : > { %4210 = shalt.err (!%p4207_p11)
}
  0x7b   : > { %3985 = dma.hbm_to_vmem [thread:$0]  (!%p4659_p12), %s5469_s10, 16, %s4665_s29, [#allocation12]  }
  0x7c   : > { %s4466_s25 = smov [#allocation14]   ;;  %s4467_s3 = smov [#allocation2]  }
  0x7d   : > { %s645_s21 = sshll.u32 %s4466_s25, 4  ;;  %s561_s24 = sshll.u32 %s4467_s3, 4  ;;  %s646_s21 = int_to_ptr.vmem [resolvable:$true] %s645_s21  ;;  %s562_s24 = int_to_ptr.vmem [resolvable:$true] %s561_s24 }
  0x7e   : > { %s5470_s12 = sld [smem:[#allocation41_spill]] }
  0x84   : > { %s4211_s27 = scalar_lea.hbm %s5470_s12, 256 }
  0x85   : > { %p4212_p13 = scmp.ne.s32.totalorder %s5470_s12, %s4211_s27  ;;  %p4218_p5 = scmp.lt.u32.totalorder %s4211_s27, %s5470_s12 }
  0x87   : > { %p4214_p1 = pnand %p4212_p13, %p4675_p0 }
  0x89   : > { %p4215_p6 = pneg %p4214_p1 }
  0x8b   : > { %p4220_p9 = pnand %p4218_p5, %p4215_p6 }
  0x8d   : > { %4223 = shalt.err (!%p4220_p9)
}
  0x8e   : > { %s4224_s29 = scalar_lea.vmem %s646_s21, 256  ;;  %p4232_p4 = scmp.lt.s32.totalorder %s646_s21, %s646_s21 }
  0x8f   : > { %p4225_p10 = scmp.ne.s32.totalorder %s646_s21, %s4224_s29  ;;  %p4233_p7 = scmp.lt.s32.totalorder %s4224_s29, %s4224_s29 }
  0x91   : > { %p4227_p2 = pnand %p4225_p10, %p4675_p0  ;;  %p4234_p8 = por %p4233_p7, %p4232_p4 }
  0x93   : > { %p4228_p3 = pneg %p4227_p2 }
  0x95   : > { %p4235_p11 = pnand %p4234_p8, %p4228_p3 }
  0x97   : > { %4238 = shalt.err (!%p4235_p11)
}
  0x98   : > { %s4468_s30 = smov 64   ;;  %s4469_s25 = smov 4  }
  0x99   : > { %3991 = dma.hbm_to_vmem [thread:$0]  (!%p4659_p12), %s5470_s12, 256, %s646_s21, [#allocation15], %s4468_s30, %s4468_s30, %s4469_s25  }
  0x9a   : > { %s5471_s27 = sld [smem:[#allocation36_spill]] }
  0xa0   : > { %s4239_s1 = scalar_lea.hbm %s5471_s27, 256 }
  0xa1   : > { %p4240_p13 = scmp.ne.s32.totalorder %s5471_s27, %s4239_s1  ;;  %p4246_p5 = scmp.lt.u32.totalorder %s4239_s1, %s5471_s27 }
  0xa3   : > { %p4242_p1 = pnand %p4240_p13, %p4675_p0 }
  0xa5   : > { %p4243_p6 = pneg %p4242_p1 }
  0xa7   : > { %p4248_p9 = pnand %p4246_p5, %p4243_p6 }
  0xa9   : > { %4251 = shalt.err (!%p4248_p9)
}
  0xaa   : > { %s4252_s2 = scalar_lea.vmem %s562_s24, 256  ;;  %p4260_p4 = scmp.lt.s32.totalorder %s562_s24, %s562_s24 }
  0xab   : > { %p4253_p10 = scmp.ne.s32.totalorder %s562_s24, %s4252_s2  ;;  %p4261_p7 = scmp.lt.s32.totalorder %s4252_s2, %s4252_s2 }
  0xad   : > { %p4255_p2 = pnand %p4253_p10, %p4675_p0  ;;  %p4262_p8 = por %p4261_p7, %p4260_p4 }
  0xaf   : > { %p4256_p3 = pneg %p4255_p2 }
  0xb1   : > { %p4263_p11 = pnand %p4262_p8, %p4256_p3 }
  0xb3   : > { %4266 = shalt.err (!%p4263_p11)
}
  0xb4   : > { %3970 = dma.hbm_to_vmem [thread:$0]  (!%p4659_p12), %s5471_s27, 256, %s562_s24, [#allocation3], %s4468_s30, %s4468_s30, %s4469_s25  }
  0xb5   : > { %s4470_s3 = smov [#allocation7]   ;;  %s4471_s22 = smov [#allocation10]  }
  0xb6   : > { %s586_s23 = sshll.u32 %s4470_s3, 4  ;;  %s607_s1 = sshll.u32 %s4471_s22, 4  ;;  %s587_s23 = int_to_ptr.vmem [resolvable:$true] %s586_s23  ;;  %s608_s1 = int_to_ptr.vmem [resolvable:$true] %s607_s1 }
  0xb7   : > { %s5472_s29 = sld [smem:[#allocation38_spill]] }
  0xbd   : > { %s5473_s2 = smov %s5472_s29  ;;  %s4267_s10 = scalar_lea.hbm %s5472_s29, 16 }
  0xbe   : > { %p4268_p13 = scmp.ne.s32.totalorder %s5473_s2, %s4267_s10  ;;  %p4274_p5 = scmp.lt.u32.totalorder %s4267_s10, %s5473_s2 }
  0xc0   : > { %p4270_p1 = pnand %p4268_p13, %p4675_p0 }
  0xc2   : > { %p4271_p6 = pneg %p4270_p1 }
  0xc4   : > { %p4276_p9 = pnand %p4274_p5, %p4271_p6 }
  0xc6   : > { %4279 = shalt.err (!%p4276_p9)
}
  0xc7   : > { %s4280_s24 = scalar_lea.vmem %s587_s23, 16  ;;  %s4287_s21 = scalar_lea.vmem %s587_s23, 32 }
  0xc8   : > { %p4281_p10 = scmp.ne.s32.totalorder %s587_s23, %s4280_s24  ;;  %p4288_p4 = scmp.lt.s32.totalorder %s587_s23, %s587_s23 }
  0xc9   : > { %p4289_p7 = scmp.lt.s32.totalorder %s4287_s21, %s4280_s24 }
  0xca   : > { %p4283_p2 = pnand %p4281_p10, %p4675_p0 }
  0xcb   : > { %p4290_p8 = por %p4289_p7, %p4288_p4 }
  0xcc   : > { %p4284_p3 = pneg %p4283_p2 }
  0xce   : > { %p4291_p11 = pnand %p4290_p8, %p4284_p3 }
  0xd0   : > { %4294 = shalt.err (!%p4291_p11)
}
  0xd1   : > { %3976 = dma.hbm_to_vmem [thread:$0]  (!%p4659_p12), %s5473_s2, 16, %s587_s23, [#allocation6]  }
  0xd2   : > { %s4295_s3 = scalar_lea.hbm %s5407_s8, 256 }
  0xd3   : > { %p4296_p13 = scmp.ne.s32.totalorder %s5407_s8, %s4295_s3  ;;  %p4302_p5 = scmp.lt.u32.totalorder %s4295_s3, %s5407_s8 }
  0xd5   : > { %p4298_p1 = pnand %p4296_p13, %p4675_p0 }
  0xd7   : > { %p4299_p6 = pneg %p4298_p1 }
  0xd9   : > { %p4304_p9 = pnand %p4302_p5, %p4299_p6 }
  0xdb   : > { %4307 = shalt.err (!%p4304_p9)
}
  0xdc   : > { %s4308_s7 = scalar_lea.vmem %s608_s1, 256  ;;  %p4316_p4 = scmp.lt.s32.totalorder %s608_s1, %s608_s1 }
  0xdd   : > { %p4309_p10 = scmp.ne.s32.totalorder %s608_s1, %s4308_s7  ;;  %p4317_p7 = scmp.lt.s32.totalorder %s4308_s7, %s4308_s7 }
  0xdf   : > { %p4311_p2 = pnand %p4309_p10, %p4675_p0  ;;  %p4318_p8 = por %p4317_p7, %p4316_p4 }
  0xe1   : > { %p4312_p3 = pneg %p4311_p2 }
  0xe3   : > { %p4319_p11 = pnand %p4318_p8, %p4312_p3 }
  0xe5   : > { %4322 = shalt.err (!%p4319_p11)
}
  0xe6   : > { %3982 = dma.hbm_to_vmem [thread:$0]  (!%p4659_p12), %s5407_s8, 256, %s608_s1, [#allocation9], %s4468_s30, %s4468_s30, %s4469_s25  }
  0xe7   : > { %s4472_s21 = smov [#allocation13]   ;;  %s4473_s28 = smov [#allocation16]  }
  0xe8   : > { %s635_s12 = sshll.u32 %s4472_s21, 4  ;;  %s659_s10 = sshll.u32 %s4473_s28, 4  ;;  %s636_s12 = int_to_ptr.vmem [resolvable:$true] %s635_s12  ;;  %s660_s10 = int_to_ptr.vmem [resolvable:$true] %s659_s10 }
  0xe9   : > { %s4323_s22 = scalar_lea.hbm %s5410_s11, 16 }
  0xea   : > { %p4324_p13 = scmp.ne.s32.totalorder %s5410_s11, %s4323_s22  ;;  %p4330_p5 = scmp.lt.u32.totalorder %s4323_s22, %s5410_s11 }
  0xec   : > { %p4326_p1 = pnand %p4324_p13, %p4675_p0 }
  0xee   : > { %p4327_p6 = pneg %p4326_p1 }
  0xf0   : > { %p4332_p9 = pnand %p4330_p5, %p4327_p6 }
  0xf2   : > { %4335 = shalt.err (!%p4332_p9)
}
  0xf3   : > { %s4336_s30 = scalar_lea.vmem %s636_s12, 16  ;;  %s4343_s25 = scalar_lea.vmem %s636_s12, 32 }
  0xf4   : > { %p4337_p10 = scmp.ne.s32.totalorder %s636_s12, %s4336_s30  ;;  %p4344_p4 = scmp.lt.s32.totalorder %s636_s12, %s636_s12 }
  0xf5   : > { %p4345_p7 = scmp.lt.s32.totalorder %s4343_s25, %s4336_s30 }
  0xf6   : > { %p4339_p2 = pnand %p4337_p10, %p4675_p0 }
  0xf7   : > { %p4346_p8 = por %p4345_p7, %p4344_p4 }
  0xf8   : > { %p4340_p3 = pneg %p4339_p2 }
  0xfa   : > { %p4347_p11 = pnand %p4346_p8, %p4340_p3 }
  0xfc   : > { %4350 = shalt.err (!%p4347_p11)
}
  0xfd   : > { %3988 = dma.hbm_to_vmem [thread:$0]  (!%p4659_p12), %s5410_s11, 16, %s636_s12, [#allocation12]  }
  0xfe   : > { %s4351_s28 = scalar_lea.hbm %s5412_s13, 16 }
  0xff   : > { %p4352_p13 = scmp.ne.s32.totalorder %s5412_s13, %s4351_s28  ;;  %p4358_p5 = scmp.lt.u32.totalorder %s4351_s28, %s5412_s13 }
 0x101   : > { %p4354_p1 = pnand %p4352_p13, %p4675_p0 }
 0x103   : > { %p4355_p6 = pneg %p4354_p1 }
 0x105   : > { %p4360_p9 = pnand %p4358_p5, %p4355_p6 }
 0x107   : > { %4363 = shalt.err (!%p4360_p9)
}
 0x108   : > { %s4364_s6 = scalar_lea.vmem %s660_s10, 16  ;;  %s4371_s12 = scalar_lea.vmem %s660_s10, 32 }
 0x109   : > { %p4365_p10 = scmp.ne.s32.totalorder %s660_s10, %s4364_s6  ;;  %p4372_p4 = scmp.lt.s32.totalorder %s660_s10, %s660_s10 }
 0x10a   : > { %p4373_p7 = scmp.lt.s32.totalorder %s4371_s12, %s4364_s6 }
 0x10b   : > { %p4367_p2 = pnand %p4365_p10, %p4675_p0 }
 0x10c   : > { %p4374_p8 = por %p4373_p7, %p4372_p4 }
 0x10d   : > { %p4368_p3 = pneg %p4367_p2 }
 0x10f   : > { %p4375_p11 = pnand %p4374_p8, %p4368_p3 }
 0x111   : > { %4378 = shalt.err (!%p4375_p11)
}
 0x112   : > { %3994 = dma.hbm_to_vmem [thread:$0]  (!%p4659_p12), %s5412_s13, 16, %s660_s10, [#allocation15]  }
 0x113   : > { %p5474_p13 = scmp.ne.s32.totalorder %s5464_s26, 0 }
 0x114   : > { %p5475_p1 = scmp.eq.s32.totalorder (!%p5474_p13), %s4623_s4, 0 }
 0x115   : > { %710 = sbr.rel (%p5474_p13) target bundleno = 4838 (0x12e6), region = 108 }
 0x11c   : > { %4424 = dma.done.wait (%p5475_p1), [#allocation3], 256   ;;  %p5476_p0 = pmov %p5475_p1 }
 0x11e   : > { %4426 = vsyncadd (%p5476_p0), [#allocation3], 4294967040  ;;  %p5477_p6 = pmov %p5476_p0 }
 0x11f   : > { %p5478_p5 = pmov %p5476_p0 }
 0x120   : > { %4428 = dma.done.wait (%p5477_p6), [#allocation6], 32  }
 0x121   : > { %4430 = vsyncadd (%p5478_p5), [#allocation6], 4294967264  ;;  %p5479_p9 = pmov %p5476_p0 }
 0x122   : > { %p5480_p12 = pmov %p5476_p0 }
 0x123   : > { %4432 = dma.done.wait (%p5479_p9), [#allocation9], 272  }
 0x124   : > { %4434 = vsyncadd (%p5480_p12), [#allocation9], 4294967024  ;;  %p5481_p10 = pmov %p5476_p0 }
 0x125   : > { %p5482_p2 = pmov %p5476_p0 }
 0x126   : > { %4436 = dma.done.wait (%p5481_p10), [#allocation12], 32  }
 0x127   : > { %4438 = vsyncadd (%p5482_p2), [#allocation12], 4294967264  ;;  %p5483_p3 = pmov %p5476_p0 }
 0x128   : > { %p5484_p4 = pmov %p5476_p0 }
 0x129   : > { %4440 = dma.done.wait (%p5483_p3), [#allocation15], 272  }
 0x12a   : > { %4442 = vsyncadd (%p5484_p4), [#allocation15], 4294967024  ;;  %p807_p7 = scmp.lt.s32.totalorder %s4623_s4, 1  ;;  %v4474_v0 = vmov 0.0   ;;  %vm4475_vm0 = vmmov 0   ;;  %s5485_s30 = sld [smem:[#allocation33_spill]]  ;;  %v816_v14 = vlaneseq }
 0x12b   : > { %3773 = vmatprep.subr.bf16.mxu1 %v4474_v0  ;;  %3777 = vmatprep.mubr.msk.bf16.mxu1 %vm4475_vm0, %v4474_v0  ;;  %s5486_s24 = sld [smem:[#allocation34_spill]]  ;;  %vm848_vm1 = vcmask 261120   ;;  %s5487_s22 = sld [smem:[#allocation35_spill]]  ;;  %v4480_v15 = vmov 1983009808   ;;  %vm1346_vm2 = vcmask 64512  }
 0x12c   : > { %s4883_s26 = scalar_select %p807_p7, %s4623_s4, 1  ;;  %3787 = vmatprep.subr.bf16.mxu0 %v4474_v0  ;;  %3789 = vmatprep.mubr.msk.bf16.mxu0 %vm4475_vm0, %v4474_v0  ;;  %v905_v16 = vunpack.c.l.s4 %v4480_v15  ;;  %v4935_v17 = vshrl.u32 %v816_v14, 7  ;;  %v4481_v19 = vmov 1934713408   ;;  %vm1582_vm4 = vcmask 1043456  }
 0x12d   : > { %s4476_s20 = smov 104   ;;  %s4477_s6 = smov 120   ;;  %v937_v20 = vunpack.c.l.s4 %v4481_v19  ;;  %vm1913_vm5 = vcmask 130048   ;;  %vm1915_vm6 = vcmask 195584   ;;  %vm3373_vm7 = vcmask 523264  }
 0x12e   : > { %s3644_s5 = sshll.u32 %s4883_s26, 3  ;;  %s4478_s12 = smov 96   ;;  %v906_v18 = vunpack.c.0.s8 %v905_v16 }
 0x12f   : > { %s4479_s29 = smov 112   ;;  %v938_v26 = vunpack.c.0.s8 %v937_v20  ;;  %s4482_s7 = smov 64  }
 0x130   : > { %s814_s25 = scalar_lea.vmem %s5485_s30, %s3644_s5  ;;  %v4942_v23 = vsub.s32 %v906_v18, %v4935_v17  ;;  %s4483_s0 = smov 16  }
 0x131   : > { %v4073_v1 = vld [vmem:[%s5486_s24] sm:$0xff]   ;;  %v4074_v2 = vld [vmem:[%s5486_s24 + $0x8] sm:$0xff]   ;;  %v4953_v33 = vsub.s32 %v938_v26, %v4935_v17  ;;  %s4484_s10 = smov 8   ;;  %s4485_s30 = smov 24  }
 0x132   : > { %3774 = vmatpush3.bf16.msra.mxu1 %v4073_v1  ;;  %v4900_v3 = vld [vmem:[%s814_s25] sm:$0xff]  ;;  %s5488_s23 = sld [smem:[#allocation32_spill]]  ;;  %s5494_s26 = sld [smem:[#allocation45_spill]] }
 0x133   : > { %3775 = vmatprep.subr.bf16.mxu1 %v4474_v0  ;;  %v824_v4 = vpack.c.bf16 %v4900_v3, %v4900_v3  ;;  %v3646_v5 = vld [vmem:[%s5487_s22] ss:$0 sm:$0xff] }
 0x136   : > { %3776 = vmatpush3.bf16.msra.mxu1 %v4074_v2 }
 0x137   : > { %3781 = vmatprep.subr.bf16.mxu1 %v4474_v0 }
 0x138   : > { %s810_s21 = scalar_lea.vmem %s5488_s23, %s3644_s5  ;;  %s5493_s23 = sld [smem:[#allocation44_spill]] }
 0x139   : > { %3778 = vmatmul.mubr.msk.bf16.vlgmr.msra.gmra.mrb[0].mxu1 %vm848_vm1, %v824_v4 }
 0x13a   : > { %3783 = vmatprep.mubr.msk.bf16.mxu1 %vm4475_vm0, %v4474_v0 }
 0x20c   : > { %v886_v6 = vpop.f32.mrb[0].mxu1 }
 0x20d   : > { %v4912_v7 = vadd.f32 %v3646_v5, %v886_v6  ;;  %v3779_v8 = vpop.f32.mrb[1].mxu1 }
 0x20e   : > { %v889_v9 = vpop.f32.mrb[2].mxu1 }
 0x20f   : > { %899 = vrot.lane.b32.xlu1 %v4912_v7, %s4476_s20  ;;  %893 = vrot.lane.b32.xlu0 %v4912_v7, %s4477_s6  ;;  %v3780_v10 = vpop.f32.mrb[3].mxu1 }
 0x213   : > { %1042 = vrot.lane.b32.xlu1 %v4912_v7, %s4478_s12  ;;  %896 = vrot.lane.b32.xlu0 %v4912_v7, %s4479_s29 }
 0x281   : > { %v4922_v11 = vpop.permute.xlu0 %893  ;;  %v4926_v12 = vpop.permute.xlu1 %899 }
 0x282   : > { %1044 = vrot.lane.b32.xlu0 %v4922_v11, %s4478_s12  ;;  %v918_v24 = vcombine.low %v4922_v11, %v4926_v12  ;;  %v919_v25 = vcombine.high %v4922_v11, %v4926_v12 }
 0x284   : > { %v926_v29 = vrot.slane %v918_v24, %v4942_v23  ;;  %v933_v30 = vrot.slane %v919_v25, %v4942_v23 }
 0x285   : > { %v4928_v13 = vpop.permute.xlu0 %896  ;;  %v1043_v31 = vpop.permute.xlu1 %1042 }
 0x286   : > { %1048 = vrot.lane.b32.xlu0 %v4926_v12, %s4478_s12  ;;  %1046 = vrot.lane.b32.xlu1 %v4928_v13, %s4478_s12  ;;  %v902_v21 = vcombine.low %v4912_v7, %v4928_v13  ;;  %v903_v22 = vcombine.high %v4912_v7, %v4928_v13 }
 0x288   : > { %v910_v27 = vrot.slane %v902_v21, %v4942_v23  ;;  %v917_v28 = vrot.slane %v903_v22, %v4942_v23 }
 0x28a   : > { %v934_v34 = vcombine.low %v910_v27, %v926_v29  ;;  %v935_v35 = vcombine.high %v910_v27, %v926_v29  ;;  %v950_v36 = vcombine.low %v917_v28, %v933_v30  ;;  %v951_v37 = vcombine.high %v917_v28, %v933_v30 }
 0x28c   : > { %v942_v44 = vrot.slane %v934_v34, %v4953_v33  ;;  %v949_v45 = vrot.slane %v935_v35, %v4953_v33  ;;  %v958_v46 = vrot.slane %v950_v36, %v4953_v33  ;;  %v965_v47 = vrot.slane %v951_v37, %v4953_v33 }
 0x28e   : > { %v970_v56 = vcombine.low %v942_v44, %v949_v45  ;;  %v3650_v57 = vcombine.high %v942_v44, %v949_v45  ;;  %v986_v58 = vcombine.low %v958_v46, %v965_v47  ;;  %v3651_v59 = vcombine.high %v958_v46, %v965_v47 }
 0x290   : > { %v977_v6 = vrot.slane %v970_v56, %v4942_v23  ;;  %v985_v8 = vrot.slane %v3650_v57, %v4942_v23  ;;  %v993_v9 = vrot.slane %v986_v58, %v4942_v23  ;;  %v1001_v10 = vrot.slane %v3651_v59, %v4942_v23 }
 0x291   : > { %v819_v58 = vand.u32 127, %v816_v14 }
 0x292   : > { %v1002_v27 = vcombine.low %v977_v6, %v985_v8  ;;  %v1018_v28 = vcombine.low %v993_v9, %v1001_v10  ;;  %v1019_v45 = vcombine.high %v993_v9, %v1001_v10 }
 0x293   : > { %vm820_vm3 = vcmp.gt.s32.totalorder %v819_v58, %v4935_v17 }
 0x294   : > { %v1010_v36 = vrot.slane %v1002_v27, %v4953_v33  ;;  %v1026_v37 = vrot.slane %v1018_v28, %v4953_v33  ;;  %v821_v59 = vsel %vm820_vm3, -1e+09, %v4474_v0 }
 0x296   : > { %v1035_v44 = vcombine.high %v1010_v36, %v1026_v37 }
 0x2f4   : > { %v1045_v32 = vpop.permute.xlu0 %1044 }
 0x2f8   : > { %v1047_v38 = vpop.permute.xlu1 %1046  ;;  %v1049_v39 = vpop.permute.xlu0 %1048 }
 0x2f9   : > { %v1054_v40 = vcombine.low %v1043_v31, %v1047_v38  ;;  %v1055_v41 = vcombine.high %v1043_v31, %v1047_v38  ;;  %v1070_v42 = vcombine.low %v1045_v32, %v1049_v39  ;;  %v1071_v43 = vcombine.high %v1045_v32, %v1049_v39 }
 0x2fb   : > { %v1062_v48 = vrot.slane %v1054_v40, %v4942_v23  ;;  %v1069_v49 = vrot.slane %v1055_v41, %v4942_v23  ;;  %v1078_v50 = vrot.slane %v1070_v42, %v4942_v23  ;;  %v1085_v51 = vrot.slane %v1071_v43, %v4942_v23 }
 0x2fc   : > { %v1003_v42 = vcombine.high %v977_v6, %v985_v8  ;;  %v1034_v43 = vcombine.low %v1010_v36, %v1026_v37 }
 0x2fd   : > { %v1086_v52 = vcombine.low %v1062_v48, %v1078_v50  ;;  %v1087_v53 = vcombine.high %v1062_v48, %v1078_v50  ;;  %v1102_v54 = vcombine.low %v1069_v49, %v1085_v51  ;;  %v1103_v55 = vcombine.high %v1069_v49, %v1085_v51 }
 0x2fe   : > { %v1038_v48 = vpack.c.bf16 %v1034_v43, %v1034_v43  ;;  %v1039_v49 = vpack.c.bf16 %v1035_v44, %v1035_v44  ;;  %v1017_v50 = vrot.slane %v1003_v42, %v4953_v33  ;;  %v1033_v51 = vrot.slane %v1019_v45, %v4953_v33 }
 0x2ff   : > { %v1094_v60 = vrot.slane %v1086_v52, %v4953_v33  ;;  %v1101_v61 = vrot.slane %v1087_v53, %v4953_v33  ;;  %v1110_v62 = vrot.slane %v1102_v54, %v4953_v33  ;;  %v1117_v63 = vrot.slane %v1103_v55, %v4953_v33 }
 0x300   : > { %v1036_v54 = vcombine.low %v1017_v50, %v1033_v51  ;;  %v1037_v55 = vcombine.high %v1017_v50, %v1033_v51 }
 0x301   : > { %v1122_v1 = vcombine.low %v1094_v60, %v1101_v61  ;;  %v3652_v2 = vcombine.high %v1094_v60, %v1101_v61  ;;  %v1138_v4 = vcombine.low %v1110_v62, %v1117_v63  ;;  %v3653_v5 = vcombine.high %v1110_v62, %v1117_v63 }
 0x302   : > { %v1040_v56 = vpack.c.bf16 %v1036_v54, %v1036_v54  ;;  %v1041_v57 = vpack.c.bf16 %v1037_v55, %v1037_v55 }
 0x303   : > { %v1129_v15 = vrot.slane %v1122_v1, %v4942_v23  ;;  %v1137_v16 = vrot.slane %v3652_v2, %v4942_v23  ;;  %v1145_v18 = vrot.slane %v1138_v4, %v4942_v23  ;;  %v1153_v19 = vrot.slane %v3653_v5, %v4942_v23 }
 0x305   : > { %v1154_v20 = vcombine.low %v1129_v15, %v1137_v16  ;;  %v1170_v21 = vcombine.low %v1145_v18, %v1153_v19  ;;  %v1155_v22 = vcombine.high %v1129_v15, %v1137_v16  ;;  %v1171_v24 = vcombine.high %v1145_v18, %v1153_v19 }
 0x307   : > { %v1162_v25 = vrot.slane %v1154_v20, %v4953_v33  ;;  %v1178_v26 = vrot.slane %v1170_v21, %v4953_v33  ;;  %v1169_v31 = vrot.slane %v1155_v22, %v4953_v33  ;;  %v1185_v32 = vrot.slane %v1171_v24, %v4953_v33 }
 0x309   : > { %v1186_v29 = vcombine.low %v1162_v25, %v1178_v26  ;;  %v1187_v30 = vcombine.high %v1162_v25, %v1178_v26  ;;  %v1188_v40 = vcombine.low %v1169_v31, %v1185_v32  ;;  %v1189_v41 = vcombine.high %v1169_v31, %v1185_v32 }
 0x30b   : > { %v1190_v34 = vpack.c.bf16 %v1186_v29, %v1186_v29  ;;  %v1191_v35 = vpack.c.bf16 %v1187_v30, %v1187_v30  ;;  %v1192_v46 = vpack.c.bf16 %v1188_v40, %v1188_v40  ;;  %v1193_v47 = vpack.c.bf16 %v1189_v41, %v1189_v41 }
 0x30d   : > { %v1351_v38 = vsel %vm1346_vm2, %v1190_v34, 0  ;;  %v1397_v39 = vsel %vm1346_vm2, %v1191_v35, 0  ;;  %v1443_v52 = vsel %vm1346_vm2, %v1192_v46, 0  ;;  %v1489_v53 = vsel %vm1346_vm2, %v1193_v47, 0 }
 0x30e   : > { %3782 = vmatpush3.bf16.xpose.msra.mxu1 %v1351_v38  ;;  %3788 = vmatpush3.bf16.xpose.msra.mxu0 %v1397_v39 }
 0x30f   : > { %3793 = vmatprep.subr.bf16.mxu1 %v4474_v0  ;;  %3799 = vmatprep.subr.bf16.mxu0 %v4474_v0 }
 0x315   : > { %3784 = vmatmul.mubr.msk.bf16.vlgmr.msra.gmra.mrb[4].mxu1 %vm1346_vm2, %v1038_v48  ;;  %3790 = vmatmul.mubr.msk.bf16.vlgmr.msra.gmra.mrb[0].mxu0 %vm1346_vm2, %v1039_v49 }
 0x316   : > { %3794 = vmatpush3.bf16.xpose.msra.mxu1 %v1443_v52  ;;  %3800 = vmatpush3.bf16.xpose.msra.mxu0 %v1489_v53 }
 0x317   : > { %3795 = vmatprep.mubr.msk.bf16.mxu1 %vm4475_vm0, %v4474_v0  ;;  %3801 = vmatprep.mubr.msk.bf16.mxu0 %vm4475_vm0, %v4474_v0 }
 0x318   : > { %3805 = vmatprep.subr.bf16.mxu1 %v4474_v0  ;;  %3811 = vmatprep.subr.bf16.mxu0 %v4474_v0 }
 0x31d   : > { %3796 = vmatmul.mubr.msk.bf16.vlgmr.msra.gmra.mrb[8].mxu1 %vm1346_vm2, %v1040_v56  ;;  %3802 = vmatmul.mubr.msk.bf16.vlgmr.msra.gmra.mrb[4].mxu0 %vm1346_vm2, %v1041_v57 }
 0x31e   : > { %3807 = vmatprep.mubr.msk.bf16.mxu1 %vm4475_vm0, %v4474_v0  ;;  %3813 = vmatprep.mubr.msk.bf16.mxu0 %vm4475_vm0, %v4474_v0 }
 0x3e8   : > { %v1387_v60 = vpop.f32.mrb[4].mxu1  ;;  %v1433_v61 = vpop.f32.mrb[0].mxu0 }
 0x3e9   : > { %v1388_v62 = vadd.f32 %v1387_v60, %v821_v59  ;;  %v1434_v63 = vadd.f32 %v1433_v61, %v821_v59  ;;  %v3785_v1 = vpop.f32.mrb[5].mxu1  ;;  %v3791_v2 = vpop.f32.mrb[1].mxu0 }
 0x3ea   : > { %v1390_v4 = vpop.f32.mrb[6].mxu1  ;;  %v1436_v5 = vpop.f32.mrb[2].mxu0 }
 0x3eb   : > { %v3786_v6 = vpop.f32.mrb[7].mxu1  ;;  %v3792_v8 = vpop.f32.mrb[3].mxu0  ;;  %v1534_v9 = vsel %vm1346_vm2, %v1434_v63, -inf  ;;  %v1531_v10 = vsel %vm1346_vm2, %v1388_v62, -inf }
 0x3ec   : > { %1535 = vmax.xlane.f32.xlu0 %v1534_v9  ;;  %1532 = vmax.xlane.f32.xlu1 %v1531_v10 }
 0x3f0   : > { %v1479_v14 = vpop.f32.mrb[8].mxu1  ;;  %v1525_v17 = vpop.f32.mrb[4].mxu0 }
 0x3f1   : > { %v1480_v15 = vadd.f32 %v1479_v14, %v821_v59  ;;  %v1526_v16 = vadd.f32 %v1525_v17, %v821_v59  ;;  %v3797_v18 = vpop.f32.mrb[9].mxu1  ;;  %v3803_v19 = vpop.f32.mrb[5].mxu0 }
 0x3f2   : > { %v1482_v20 = vpop.f32.mrb[10].mxu1  ;;  %v1528_v21 = vpop.f32.mrb[6].mxu0 }
 0x3f3   : > { %v3798_v22 = vpop.f32.mrb[11].mxu1  ;;  %v3804_v24 = vpop.f32.mrb[7].mxu0  ;;  %v1540_v25 = vsel %vm1346_vm2, %v1526_v16, -inf  ;;  %v1537_v26 = vsel %vm1346_vm2, %v1480_v15, -inf }
 0x3f4   : > { %1541 = vmax.xlane.f32.xlu1 %v1540_v25  ;;  %1538 = vmax.xlane.f32.xlu0 %v1537_v26 }
 0x405   : > { %1196 = vrot.lane.b32.xlu1 %v4922_v11, %s4482_s7 }
 0x40a   : > { %1194 = vrot.lane.b32.xlu0 %v4912_v7, %s4482_s7 }
 0x479   : > { %v1536_v27 = vpop.xlane.xlu0 %1535  ;;  %v1533_v28 = vpop.xlane.xlu1 %1532 }
 0x47a   : > { %v1544_v29 = vsub.f32 %v1434_v63, %v1536_v27  ;;  %v1543_v30 = vsub.f32 %v1388_v62, %v1533_v28 }
 0x47c   : > { %v1549_v31 = vmul.f32 1.442695, %v1544_v29  ;;  %v1547_v32 = vmul.f32 1.442695, %v1543_v30 }
 0x47e   : > { %4089 = vpow2.f32 %v1549_v31 }
 0x47f   : > { %4091 = vpow2.f32 %v1547_v32 }
 0x481   : > { %v1539_v7 = vpop.xlane.xlu0 %1538  ;;  %v1542_v37 = vpop.xlane.xlu1 %1541 }
 0x482   : > { %v1545_v38 = vsub.f32 %v1480_v15, %v1539_v7  ;;  %v1546_v39 = vsub.f32 %v1526_v16, %v1542_v37 }
 0x484   : > { %v1551_v40 = vmul.f32 1.442695, %v1545_v38  ;;  %v1553_v41 = vmul.f32 1.442695, %v1546_v39 }
 0x485   : > { %v1195_v45 = vpop.permute.xlu0 %1194 }
 0x486   : > { %4093 = vpow2.f32 %v1551_v40 }
 0x487   : > { %4095 = vpow2.f32 %v1553_v41 }
 0x488   : > { %v5012_v34 = vpop.eup %4089 }
 0x489   : > { %v5014_v35 = vpop.eup %4091  ;;  %v1558_v36 = vsel %vm1346_vm2, %v5012_v34, 0.0 }
 0x48a   : > { %1559 = vadd.xlane.f32.xlu1 %v1558_v36  ;;  %v1555_v11 = vsel %vm1346_vm2, %v5014_v35, 0.0 }
 0x48b   : > { %1556 = vadd.xlane.f32.xlu0 %v1555_v11 }
 0x490   : > { %v5022_v42 = vpop.eup %4093 }
 0x491   : > { %v5024_v43 = vpop.eup %4095  ;;  %v1561_v44 = vsel %vm1346_vm2, %v5022_v42, 0.0 }
 0x49b   : > { %1198 = vrot.lane.b32.xlu1 %v4928_v13, %s4482_s7  ;;  %v1564_v13 = vsel %vm1346_vm2, %v5024_v43, 0.0 }
 0x4a1   : > { %1200 = vrot.lane.b32.xlu0 %v4926_v12, %s4482_s7  ;;  %v1197_v12 = vpop.permute.xlu1 %1196  ;;  %s5491_s7 = sld [smem:[#allocation30_spill]] }
 0x4a7   : > { %p5495_p11 = scmp.ne.s32.totalorder %s5491_s7, 0 }
 0x4bf   : > { %1562 = vadd.xlane.f32.xlu1 %v1561_v44 }
 0x4c0   : > { %1565 = vadd.xlane.f32.xlu0 %v1564_v13 }
 0x517   : > { %v1560_v46 = vpop.xlane.xlu1 %1559 }
 0x518   : > { %v1557_v47 = vpop.xlane.xlu0 %1556  ;;  %4097 = vrcp.f32 %v1560_v46 }
 0x519   : > { %4099 = vrcp.f32 %v1557_v47 }
 0x51b   : > { %v1199_v48 = vpop.permute.xlu1 %1198 }
 0x51c   : > { %v1206_v49 = vcombine.low %v1195_v45, %v1199_v48  ;;  %v1207_v50 = vcombine.high %v1195_v45, %v1199_v48  ;;  %v1201_v51 = vpop.permute.xlu0 %1200 }
 0x51d   : > { %v1222_v52 = vcombine.low %v1197_v12, %v1201_v51  ;;  %v1223_v53 = vcombine.high %v1197_v12, %v1201_v51 }
 0x51e   : > { %v1214_v54 = vrot.slane %v1206_v49, %v4942_v23  ;;  %v1221_v55 = vrot.slane %v1207_v50, %v4942_v23 }
 0x51f   : > { %v1230_v56 = vrot.slane %v1222_v52, %v4942_v23  ;;  %v1237_v57 = vrot.slane %v1223_v53, %v4942_v23 }
 0x521   : > { %v1238_v58 = vcombine.low %v1214_v54, %v1230_v56  ;;  %v1239_v59 = vcombine.high %v1214_v54, %v1230_v56  ;;  %v1254_v60 = vcombine.low %v1221_v55, %v1237_v57  ;;  %v1255_v61 = vcombine.high %v1221_v55, %v1237_v57 }
 0x522   : > { %v4098_v22 = vpop.eup %4097 }
 0x523   : > { %v1246_v62 = vrot.slane %v1238_v58, %v4953_v33  ;;  %v1253_v63 = vrot.slane %v1239_v59, %v4953_v33  ;;  %v1262_v1 = vrot.slane %v1254_v60, %v4953_v33  ;;  %v1269_v2 = vrot.slane %v1255_v61, %v4953_v33  ;;  %v4100_v26 = vpop.eup %4099 }
 0x524   : > { %v1572_v31 = vmul.f32 %v4098_v22, %v5012_v34  ;;  %v1571_v32 = vmul.f32 %v4100_v26, %v5014_v35 }
 0x525   : > { %v1274_v4 = vcombine.low %v1246_v62, %v1253_v63  ;;  %v3654_v5 = vcombine.high %v1246_v62, %v1253_v63  ;;  %v1290_v6 = vcombine.low %v1262_v1, %v1269_v2  ;;  %v3655_v8 = vcombine.high %v1262_v1, %v1269_v2 }
 0x526   : > { %v1575_v40 = vpack.c.bf16 %v1571_v32, %v1571_v32  ;;  %v1576_v41 = vpack.c.bf16 %v1572_v31, %v1572_v31 }
 0x527   : > { %v1281_v9 = vrot.slane %v1274_v4, %v4942_v23  ;;  %v1289_v10 = vrot.slane %v3654_v5, %v4942_v23  ;;  %v1297_v14 = vrot.slane %v1290_v6, %v4942_v23  ;;  %v1305_v17 = vrot.slane %v3655_v8, %v4942_v23 }
 0x529   : > { %v1306_v15 = vcombine.low %v1281_v9, %v1289_v10  ;;  %v1307_v16 = vcombine.high %v1281_v9, %v1289_v10  ;;  %v1322_v18 = vcombine.low %v1297_v14, %v1305_v17  ;;  %v1323_v19 = vcombine.high %v1297_v14, %v1305_v17 }
 0x52b   : > { %v1314_v20 = vrot.slane %v1306_v15, %v4953_v33  ;;  %v1321_v21 = vrot.slane %v1307_v16, %v4953_v33  ;;  %v1330_v24 = vrot.slane %v1322_v18, %v4953_v33  ;;  %v1337_v25 = vrot.slane %v1323_v19, %v4953_v33  ;;  %v4075_v18 = vld [vmem:[#allocation2] sm:$0xff]  }
 0x52d   : > { %v1338_v27 = vcombine.low %v1314_v20, %v1330_v24  ;;  %v1339_v28 = vcombine.high %v1314_v20, %v1330_v24  ;;  %v1340_v29 = vcombine.low %v1321_v21, %v1337_v25  ;;  %v1341_v30 = vcombine.high %v1321_v21, %v1337_v25 }
 0x52f   : > { %v1342_v36 = vpack.c.bf16 %v1338_v27, %v1338_v27  ;;  %v1343_v11 = vpack.c.bf16 %v1339_v28, %v1339_v28  ;;  %v1344_v38 = vpack.c.bf16 %v1340_v29, %v1340_v29  ;;  %v1345_v39 = vpack.c.bf16 %v1341_v30, %v1341_v30  ;;  %v4076_v28 = vld [vmem:[#allocation2 + $0x8] sm:$0xff]  }
 0x531   : > { %v1584_v7 = vsel %vm1582_vm4, %v1342_v36, 0  ;;  %v1630_v37 = vsel %vm1582_vm4, %v1343_v11, 0  ;;  %v1676_v34 = vsel %vm1582_vm4, %v1344_v38, 0  ;;  %v1722_v35 = vsel %vm1582_vm4, %v1345_v39, 0 }
 0x532   : > { %3806 = vmatpush3.bf16.msra.mxu1 %v1584_v7  ;;  %3812 = vmatpush3.bf16.msra.mxu0 %v1630_v37 }
 0x533   : > { %3817 = vmatprep.subr.bf16.mxu1 %v4474_v0  ;;  %3823 = vmatprep.subr.bf16.mxu0 %v4474_v0 }
 0x535   : > { %3808 = vmatmul.mubr.msk.bf16.vlgmr.msra.gmra.mrb[12].mxu1 %vm1346_vm2, %v1575_v40  ;;  %3814 = vmatmul.mubr.msk.bf16.vlgmr.msra.gmra.mrb[8].mxu0 %vm1346_vm2, %v1576_v41 }
 0x536   : > { %3818 = vmatpush3.bf16.msra.mxu1 %v1676_v34  ;;  %3824 = vmatpush3.bf16.msra.mxu0 %v1722_v35 }
 0x537   : > { %3819 = vmatprep.mubr.msk.bf16.mxu1 %vm4475_vm0, %v4474_v0  ;;  %3825 = vmatprep.mubr.msk.bf16.mxu0 %vm4475_vm0, %v4474_v0 }
 0x538   : > { %3829 = vmatprep.subr.bf16.mxu1 %v4474_v0  ;;  %3837 = vmatprep.subr.bf16.mxu0 %v4474_v0 }
 0x54c   : > { %v1563_v44 = vpop.xlane.xlu1 %1562 }
 0x54d   : > { %4101 = vrcp.f32 %v1563_v44  ;;  %v1566_v13 = vpop.xlane.xlu0 %1565 }
 0x54e   : > { %4103 = vrcp.f32 %v1566_v13 }
 0x557   : > { %v4102_v12 = vpop.eup %4101 }
 0x558   : > { %v4104_v45 = vpop.eup %4103  ;;  %v1573_v46 = vmul.f32 %v4102_v12, %v5022_v42 }
 0x559   : > { %v1574_v47 = vmul.f32 %v4104_v45, %v5024_v43 }
 0x55a   : > { %v1577_v48 = vpack.c.bf16 %v1573_v46, %v1573_v46 }
 0x55b   : > { %v1578_v49 = vpack.c.bf16 %v1574_v47, %v1574_v47 }
 0x55c   : > { %3820 = vmatmul.mubr.msk.bf16.vlgmr.msra.gmra.mrb[16].mxu1 %vm1346_vm2, %v1577_v48 }
 0x55d   : > { %3826 = vmatmul.mubr.msk.bf16.vlgmr.msra.gmra.mrb[12].mxu0 %vm1346_vm2, %v1578_v49  ;;  %3833 = vmatprep.mubr.msk.bf16.mxu1 %vm4475_vm0, %v4474_v0 }
 0x55e   : > { %3841 = vmatprep.mubr.msk.bf16.mxu0 %vm4475_vm0, %v4474_v0  ;;  %3830 = vmatpush3.bf16.msra.mxu1 %v4075_v18 }
 0x55f   : > { %3831 = vmatprep.subr.bf16.mxu1 %v4474_v0 }
 0x562   : > { %3832 = vmatpush3.bf16.msra.mxu1 %v4076_v28 }
 0x563   : > { %3845 = vmatprep.subr.bf16.mxu1 %v4474_v0 }
 0x608   : > { %v1620_v50 = vpop.f32.mrb[12].mxu1  ;;  %v1666_v51 = vpop.f32.mrb[8].mxu0 }
 0x609   : > { %v3809_v52 = vpop.f32.mrb[13].mxu1  ;;  %v3815_v53 = vpop.f32.mrb[9].mxu0 }
 0x60a   : > { %v1623_v54 = vpop.f32.mrb[14].mxu1  ;;  %v1669_v42 = vpop.f32.mrb[10].mxu0 }
 0x60b   : > { %v3810_v55 = vpop.f32.mrb[15].mxu1  ;;  %v3816_v43 = vpop.f32.mrb[11].mxu0 }
 0x62f   : > { %v1712_v56 = vpop.f32.mrb[16].mxu1 }
 0x630   : > { %v1764_v57 = vcombine.low %v1620_v50, %v1712_v56  ;;  %v1765_v58 = vcombine.high %v1620_v50, %v1712_v56  ;;  %v1758_v59 = vpop.f32.mrb[12].mxu0  ;;  %v3821_v60 = vpop.f32.mrb[17].mxu1 }
 0x631   : > { %v1780_v61 = vcombine.low %v1666_v51, %v1758_v59  ;;  %v1781_v62 = vcombine.high %v1666_v51, %v1758_v59  ;;  %v3827_v63 = vpop.f32.mrb[13].mxu0  ;;  %v1715_v1 = vpop.f32.mrb[18].mxu1  ;;  %v3666_v51 = vld [vmem:[#allocation5] ss:$0 sm:$0xff]  ;;  %v823_v59 = vld [vmem:[%s810_s21] sm:$0xff]  ;;  %s3715_s21 = sshll.u32 %s4623_s4, 7 }
 0x632   : > { %v1772_v2 = vrot.slane %v1764_v57, %v4942_v23  ;;  %v1779_v4 = vrot.slane %v1765_v58, %v4942_v23  ;;  %v1761_v5 = vpop.f32.mrb[14].mxu0  ;;  %v3822_v6 = vpop.f32.mrb[19].mxu1  ;;  %v4077_v57 = vld [vmem:[%s5408_s9] sm:$0xff]   ;;  %v4078_v58 = vld [vmem:[%s5408_s9 + $0x8] sm:$0xff]   ;;  %s5356_s5 = scalar_lea.hbm %s5494_s26, %s3715_s21  ;;  %s4486_s4 = smov [#allocation17]  }
 0x633   : > { %v1788_v8 = vrot.slane %v1780_v61, %v4942_v23  ;;  %v1795_v9 = vrot.slane %v1781_v62, %v4942_v23  ;;  %v3828_v10 = vpop.f32.mrb[15].mxu0  ;;  %v3676_v5 = vld [vmem:[#allocation13] ss:$0 sm:$0xff] }
 0x635   : > { %v1796_v14 = vcombine.low %v1772_v2, %v1788_v8  ;;  %v1797_v17 = vcombine.high %v1772_v2, %v1788_v8  ;;  %v1812_v15 = vcombine.low %v1779_v4, %v1795_v9  ;;  %v1813_v16 = vcombine.high %v1779_v4, %v1795_v9  ;;  %v4079_v2 = vld [vmem:[#allocation10] sm:$0xff]   ;;  %v4080_v4 = vld [vmem:[#allocation10 + $0x8] sm:$0xff]  }
 0x636   : > { %3838 = vmatpush3.bf16.msra.mxu0 %v4079_v2  ;;  %v3672_v2 = vld [vmem:[#allocation11] ss:$0 sm:$0xff] }
 0x637   : > { %v1804_v19 = vrot.slane %v1796_v14, %v4953_v33  ;;  %v1811_v20 = vrot.slane %v1797_v17, %v4953_v33  ;;  %v1820_v21 = vrot.slane %v1812_v15, %v4953_v33  ;;  %v1827_v22 = vrot.slane %v1813_v16, %v4953_v33  ;;  %3839 = vmatprep.subr.bf16.mxu0 %v4474_v0 }
 0x639   : > { %v1832_v24 = vcombine.low %v1804_v19, %v1811_v20  ;;  %v3664_v25 = vcombine.high %v1804_v19, %v1811_v20  ;;  %v1848_v26 = vcombine.low %v1820_v21, %v1827_v22  ;;  %v3665_v27 = vcombine.high %v1820_v21, %v1827_v22  ;;  %v3670_v19 = vld [vmem:[#allocation7] ss:$0 sm:$0xff]  ;;  %v3671_v21 = vld [vmem:[#allocation8] ss:$0 sm:$0xff] }
 0x63a   : > { %3840 = vmatpush3.bf16.msra.mxu0 %v4080_v4 }
 0x63b   : > { %v1839_v29 = vrot.slane %v1832_v24, %v4942_v23  ;;  %v1847_v30 = vrot.slane %v3664_v25, %v4942_v23  ;;  %v1855_v31 = vrot.slane %v1848_v26, %v4942_v23  ;;  %v1863_v32 = vrot.slane %v3665_v27, %v4942_v23  ;;  %3853 = vmatprep.subr.bf16.mxu0 %v4474_v0 }
 0x63d   : > { %v1865_v36 = vcombine.high %v1839_v29, %v1847_v30  ;;  %v1881_v11 = vcombine.high %v1855_v31, %v1863_v32  ;;  %v1864_v7 = vcombine.low %v1839_v29, %v1847_v30  ;;  %v1880_v37 = vcombine.low %v1855_v31, %v1863_v32 }
 0x63f   : > { %v1879_v38 = vrot.slane %v1865_v36, %v4953_v33  ;;  %v1895_v39 = vrot.slane %v1881_v11, %v4953_v33  ;;  %v1872_v40 = vrot.slane %v1864_v7, %v4953_v33  ;;  %v1888_v41 = vrot.slane %v1880_v37, %v4953_v33 }
 0x641   : > { %v1898_v34 = vcombine.low %v1879_v38, %v1895_v39  ;;  %v1897_v35 = vcombine.high %v1872_v40, %v1888_v41  ;;  %v1899_v44 = vcombine.high %v1879_v38, %v1895_v39  ;;  %v1896_v13 = vcombine.low %v1872_v40, %v1888_v41 }
 0x643   : > { %1905 = vrot.lane.b32.xlu1 %v1898_v34, %s4483_s0  ;;  %1901 = vrot.lane.b32.xlu0 %v1897_v35, %s4484_s10 }
 0x647   : > { %1909 = vrot.lane.b32.xlu1 %v1899_v44, %s4485_s30 }
 0x6b5   : > { %v1906_v12 = vpop.permute.xlu1 %1905  ;;  %v1902_v45 = vpop.permute.xlu0 %1901 }
 0x6b6   : > { %v1912_v46 = vsel %vm1346_vm2, %v1896_v13, %v1902_v45 }
 0x6b7   : > { %v1914_v48 = vsel %vm1913_vm5, %v1912_v46, %v1906_v12 }
 0x6b9   : > { %v1910_v47 = vpop.permute.xlu1 %1909 }
 0x6ba   : > { %v1916_v49 = vsel %vm1915_vm6, %v1914_v48, %v1910_v47 }
 0x6bb   : > { %v1917_v50 = vpack.c.bf16 %v1916_v49, %v1916_v49 }
 0x6bd   : > { %3834 = vmatmul.mubr.msk.bf16.vlgmr.msra.gmra.mrb[20].mxu1 %vm848_vm1, %v1917_v50 }
 0x6be   : > { %3849 = vmatprep.mubr.msk.bf16.mxu1 %vm4475_vm0, %v4474_v0  ;;  %3846 = vmatpush3.bf16.msra.mxu1 %v4077_v57 }
 0x6bf   : > { %3847 = vmatprep.subr.bf16.mxu1 %v4474_v0 }
 0x6c2   : > { %3848 = vmatpush3.bf16.msra.mxu1 %v4078_v58 }
 0x6c3   : > { %3859 = vmatprep.subr.bf16.mxu1 %v4474_v0 }
 0x790   : > { %v1978_v52 = vpop.f32.mrb[20].mxu1 }
 0x791   : > { %v1979_v53 = vadd.f32 %v3666_v51, %v1978_v52  ;;  %v3835_v54 = vpop.f32.mrb[21].mxu1 }
 0x792   : > { %v1981_v42 = vpop.f32.mrb[22].mxu1 }
 0x793   : > { %v3836_v55 = vpop.f32.mrb[23].mxu1  ;;  %v1984_v43 = vadd.f32 %v1979_v53, %v4900_v3  ;;  %v2082_v3 = vpack.c.bf16 %v823_v59, %v823_v59 }
 0x795   : > { %v1985_v56 = vsel %vm848_vm1, %v1984_v43, 0.0  ;;  %3850 = vmatmul.mubr.msk.bf16.vlgmr.msra.gmra.mrb[24].mxu1 %vm848_vm1, %v2082_v3 }
 0x796   : > { %1986 = vadd.xlane.f32.xlu0 %v1985_v56  ;;  %3861 = vmatprep.mubr.msk.bf16.mxu1 %vm4475_vm0, %v4474_v0 }
 0x823   : > { %v1987_v60 = vpop.xlane.xlu0 %1986 }
 0x824   : > { %v1989_v61 = vmul.f32 0.03125, %v1987_v60 }
 0x826   : > { %v1990_v62 = vsub.f32 %v1984_v43, %v1989_v61 }
 0x828   : > { %v1991_v63 = vmul.f32 %v1990_v62, %v1990_v62 }
 0x82a   : > { %v1992_v1 = vsel %vm848_vm1, %v1991_v63, 0.0 }
 0x82b   : > { %1993 = vadd.xlane.f32.xlu1 %v1992_v1 }
 0x868   : > { %v2143_v6 = vpop.f32.mrb[24].mxu1 }
 0x869   : > { %v5118_v8 = vadd.f32 %v3676_v5, %v2143_v6  ;;  %v3851_v9 = vpop.f32.mrb[25].mxu1 }
 0x86a   : > { %v2146_v10 = vpop.f32.mrb[26].mxu1 }
 0x86b   : > { %2300 = vrot.lane.b32.xlu0 %v5118_v8, %s4477_s6  ;;  %2303 = vrot.lane.b32.xlu1 %v5118_v8, %s4479_s29  ;;  %v3852_v14 = vpop.f32.mrb[27].mxu1 }
 0x86f   : > { %2306 = vrot.lane.b32.xlu0 %v5118_v8, %s4476_s20 }
 0x8b8   : > { %v1994_v17 = vpop.xlane.xlu1 %1993 }
 0x8b9   : > { %v1995_v15 = vmul.f32 0.03125, %v1994_v17 }
 0x8bb   : > { %v1996_v16 = vadd.f32 1e-05, %v1995_v15 }
 0x8bd   : > { %4105 = vrsqrt.f32 %v1996_v16 }
 0x8c7   : > { %v4106_v18 = vpop.eup %4105 }
 0x8c8   : > { %v1998_v20 = vmul.f32 %v4106_v18, %v1990_v62 }
 0x8ca   : > { %v2006_v22 = vmul.f32 %v3670_v19, %v1998_v20 }
 0x8cc   : > { %v5126_v24 = vadd.f32 %v3671_v21, %v2006_v22 }
 0x8ce   : > { %v2015_v25 = vpack.c.bf16 %v5126_v24, %v5126_v24 }
 0x8d0   : > { %3842 = vmatmul.mubr.msk.bf16.vlgmr.msra.gmra.mrb[16].mxu0 %vm848_vm1, %v2015_v25 }
 0x8d1   : > { %3855 = vmatprep.mubr.msk.bf16.mxu0 %vm4475_vm0, %v4474_v0 }
 0x8dd   : > { %v5133_v26 = vpop.permute.xlu0 %2300  ;;  %v5135_v27 = vpop.permute.xlu1 %2303 }
 0x8de   : > { %v2309_v29 = vcombine.low %v5118_v8, %v5135_v27  ;;  %v2310_v30 = vcombine.high %v5118_v8, %v5135_v27 }
 0x8e0   : > { %v2317_v36 = vrot.slane %v2309_v29, %v4942_v23  ;;  %v2324_v11 = vrot.slane %v2310_v30, %v4942_v23 }
 0x8e1   : > { %v5137_v28 = vpop.permute.xlu0 %2306 }
 0x8e2   : > { %v2325_v31 = vcombine.low %v5133_v26, %v5137_v28  ;;  %v2326_v32 = vcombine.high %v5133_v26, %v5137_v28 }
 0x8e4   : > { %v2333_v7 = vrot.slane %v2325_v31, %v4942_v23  ;;  %v2340_v37 = vrot.slane %v2326_v32, %v4942_v23 }
 0x8e6   : > { %v2341_v38 = vcombine.low %v2317_v36, %v2333_v7  ;;  %v2342_v39 = vcombine.high %v2317_v36, %v2333_v7  ;;  %v2357_v40 = vcombine.low %v2324_v11, %v2340_v37  ;;  %v2358_v41 = vcombine.high %v2324_v11, %v2340_v37 }
 0x8e8   : > { %v2349_v34 = vrot.slane %v2341_v38, %v4953_v33  ;;  %v2356_v35 = vrot.slane %v2342_v39, %v4953_v33  ;;  %v2365_v44 = vrot.slane %v2357_v40, %v4953_v33  ;;  %v2372_v13 = vrot.slane %v2358_v41, %v4953_v33 }
 0x8ea   : > { %v2377_v12 = vcombine.low %v2349_v34, %v2356_v35  ;;  %v3682_v45 = vcombine.high %v2349_v34, %v2356_v35  ;;  %v2393_v46 = vcombine.low %v2365_v44, %v2372_v13  ;;  %v3683_v47 = vcombine.high %v2365_v44, %v2372_v13 }
 0x8ec   : > { %v2384_v48 = vrot.slane %v2377_v12, %v4942_v23  ;;  %v2392_v49 = vrot.slane %v3682_v45, %v4942_v23  ;;  %v2400_v50 = vrot.slane %v2393_v46, %v4942_v23  ;;  %v2408_v51 = vrot.slane %v3683_v47, %v4942_v23 }
 0x8ee   : > { %v2409_v52 = vcombine.low %v2384_v48, %v2392_v49  ;;  %v2425_v53 = vcombine.low %v2400_v50, %v2408_v51  ;;  %v2410_v54 = vcombine.high %v2384_v48, %v2392_v49  ;;  %v2426_v42 = vcombine.high %v2400_v50, %v2408_v51 }
 0x8f0   : > { %v2417_v55 = vrot.slane %v2409_v52, %v4953_v33  ;;  %v2433_v43 = vrot.slane %v2425_v53, %v4953_v33  ;;  %v2424_v56 = vrot.slane %v2410_v54, %v4953_v33  ;;  %v2440_v57 = vrot.slane %v2426_v42, %v4953_v33 }
 0x8f2   : > { %v2441_v58 = vcombine.low %v2417_v55, %v2433_v43  ;;  %v2442_v59 = vcombine.high %v2417_v55, %v2433_v43  ;;  %v5163_v3 = vcombine.low %v2424_v56, %v2440_v57  ;;  %v5165_v60 = vcombine.high %v2424_v56, %v2440_v57 }
 0x8f4   : > { %v2445_v61 = vpack.c.bf16 %v2441_v58, %v2441_v58  ;;  %v2446_v62 = vpack.c.bf16 %v2442_v59, %v2442_v59  ;;  %v2447_v53 = vpack.c.bf16 %v5163_v3, %v5163_v3  ;;  %v2448_v54 = vpack.c.bf16 %v5165_v60, %v5165_v60 }
 0x8f6   : > { %v2605_v63 = vsel %vm1346_vm2, %v2445_v61, 0  ;;  %v2651_v1 = vsel %vm1346_vm2, %v2446_v62, 0  ;;  %v2697_v57 = vsel %vm1346_vm2, %v2447_v53, 0  ;;  %v2743_v58 = vsel %vm1346_vm2, %v2448_v54, 0 }
 0x8f7   : > { %3854 = vmatpush3.bf16.xpose.msra.mxu0 %v2605_v63  ;;  %3860 = vmatpush3.bf16.xpose.msra.mxu1 %v2651_v1 }
 0x8f8   : > { %3865 = vmatprep.subr.bf16.mxu0 %v4474_v0  ;;  %3871 = vmatprep.subr.bf16.mxu1 %v4474_v0 }
 0x9a3   : > { %v2076_v4 = vpop.f32.mrb[16].mxu0 }
 0x9a4   : > { %v2077_v5 = vadd.f32 %v3672_v2, %v2076_v4  ;;  %v3843_v6 = vpop.f32.mrb[17].mxu0 }
 0x9a5   : > { %v2079_v9 = vpop.f32.mrb[18].mxu0 }
 0x9a6   : > { %v3844_v10 = vpop.f32.mrb[19].mxu0  ;;  %2150 = vrot.lane.b32.xlu1 %v2077_v5, %s4477_s6  ;;  %2153 = vrot.lane.b32.xlu0 %v2077_v5, %s4479_s29  ;;  %s5490_s6 = sld [smem:[#allocation25_spill]] }
 0x9aa   : > { %2156 = vrot.lane.b32.xlu1 %v2077_v5, %s4476_s20  ;;  %s5489_s20 = sld [smem:[#allocation42_spill]] }
 0xa18   : > { %v2151_v14 = vpop.permute.xlu1 %2150  ;;  %v2154_v17 = vpop.permute.xlu0 %2153 }
 0xa19   : > { %v2159_v15 = vcombine.low %v2077_v5, %v2154_v17  ;;  %v2160_v16 = vcombine.high %v2077_v5, %v2154_v17 }
 0xa1b   : > { %v2167_v21 = vrot.slane %v2159_v15, %v4942_v23  ;;  %v2174_v22 = vrot.slane %v2160_v16, %v4942_v23 }
 0xa1c   : > { %v2157_v18 = vpop.permute.xlu1 %2156 }
 0xa1d   : > { %v2175_v19 = vcombine.low %v2151_v14, %v2157_v18  ;;  %v2176_v20 = vcombine.high %v2151_v14, %v2157_v18 }
 0xa1f   : > { %v2183_v25 = vrot.slane %v2175_v19, %v4942_v23  ;;  %v2190_v29 = vrot.slane %v2176_v20, %v4942_v23 }
 0xa21   : > { %v2191_v30 = vcombine.low %v2167_v21, %v2183_v25  ;;  %v2192_v31 = vcombine.high %v2167_v21, %v2183_v25  ;;  %v2207_v32 = vcombine.low %v2174_v22, %v2190_v29  ;;  %v2208_v36 = vcombine.high %v2174_v22, %v2190_v29 }
 0xa23   : > { %v2199_v11 = vrot.slane %v2191_v30, %v4953_v33  ;;  %v2206_v7 = vrot.slane %v2192_v31, %v4953_v33  ;;  %v2215_v37 = vrot.slane %v2207_v32, %v4953_v33  ;;  %v2222_v38 = vrot.slane %v2208_v36, %v4953_v33 }
 0xa25   : > { %v2227_v39 = vcombine.low %v2199_v11, %v2206_v7  ;;  %v3680_v40 = vcombine.high %v2199_v11, %v2206_v7  ;;  %v2243_v41 = vcombine.low %v2215_v37, %v2222_v38  ;;  %v3681_v34 = vcombine.high %v2215_v37, %v2222_v38 }
 0xa27   : > { %v2234_v35 = vrot.slane %v2227_v39, %v4942_v23  ;;  %v2242_v44 = vrot.slane %v3680_v40, %v4942_v23  ;;  %v2250_v13 = vrot.slane %v2243_v41, %v4942_v23  ;;  %v2258_v12 = vrot.slane %v3681_v34, %v4942_v23 }
 0xa29   : > { %v2259_v45 = vcombine.low %v2234_v35, %v2242_v44  ;;  %v2275_v46 = vcombine.low %v2250_v13, %v2258_v12  ;;  %v2260_v47 = vcombine.high %v2234_v35, %v2242_v44  ;;  %v2276_v48 = vcombine.high %v2250_v13, %v2258_v12 }
 0xa2b   : > { %v2267_v49 = vrot.slane %v2259_v45, %v4953_v33  ;;  %v2283_v50 = vrot.slane %v2275_v46, %v4953_v33  ;;  %v2274_v43 = vrot.slane %v2260_v47, %v4953_v33  ;;  %v2290_v56 = vrot.slane %v2276_v48, %v4953_v33 }
 0xa2d   : > { %v2291_v51 = vcombine.low %v2267_v49, %v2283_v50  ;;  %v2292_v52 = vcombine.high %v2267_v49, %v2283_v50  ;;  %v2293_v59 = vcombine.low %v2274_v43, %v2290_v56  ;;  %v2294_v3 = vcombine.high %v2274_v43, %v2290_v56 }
 0xa2f   : > { %v2295_v42 = vpack.c.bf16 %v2291_v51, %v2291_v51  ;;  %v2296_v55 = vpack.c.bf16 %v2292_v52, %v2292_v52  ;;  %v2297_v60 = vpack.c.bf16 %v2293_v59, %v2293_v59  ;;  %v2298_v61 = vpack.c.bf16 %v2294_v3, %v2294_v3 }
 0xa31   : > { %3856 = vmatmul.mubr.msk.bf16.vlgmr.msra.gmra.mrb[20].mxu0 %vm1346_vm2, %v2295_v42  ;;  %3862 = vmatmul.mubr.msk.bf16.vlgmr.msra.gmra.mrb[28].mxu1 %vm1346_vm2, %v2296_v55 }
 0xa32   : > { %3866 = vmatpush3.bf16.xpose.msra.mxu0 %v2697_v57  ;;  %3872 = vmatpush3.bf16.xpose.msra.mxu1 %v2743_v58 }
 0xa33   : > { %3867 = vmatprep.mubr.msk.bf16.mxu0 %vm4475_vm0, %v4474_v0  ;;  %3873 = vmatprep.mubr.msk.bf16.mxu1 %vm4475_vm0, %v4474_v0 }
 0xa34   : > { %3877 = vmatprep.subr.bf16.mxu0 %v4474_v0  ;;  %3883 = vmatprep.subr.bf16.mxu1 %v4474_v0 }
 0xa39   : > { %3868 = vmatmul.mubr.msk.bf16.vlgmr.msra.gmra.mrb[24].mxu0 %vm1346_vm2, %v2297_v60  ;;  %3874 = vmatmul.mubr.msk.bf16.vlgmr.msra.gmra.mrb[32].mxu1 %vm1346_vm2, %v2298_v61 }
 0xa3a   : > { %3879 = vmatprep.mubr.msk.bf16.mxu0 %vm4475_vm0, %v4474_v0  ;;  %3885 = vmatprep.mubr.msk.bf16.mxu1 %vm4475_vm0, %v4474_v0 }
 0xb04   : > { %v2641_v62 = vpop.f32.mrb[20].mxu0  ;;  %v2687_v63 = vpop.f32.mrb[28].mxu1 }
 0xb05   : > { %v3857_v1 = vpop.f32.mrb[21].mxu0  ;;  %v3863_v2 = vpop.f32.mrb[29].mxu1  ;;  %v2785_v4 = vsel %vm1346_vm2, %v2641_v62, -inf  ;;  %v2788_v5 = vsel %vm1346_vm2, %v2687_v63, -inf }
 0xb06   : > { %2786 = vmax.xlane.f32.xlu0 %v2785_v4  ;;  %v2644_v6 = vpop.f32.mrb[22].mxu0  ;;  %2789 = vmax.xlane.f32.xlu1 %v2788_v5  ;;  %v2690_v9 = vpop.f32.mrb[30].mxu1 }
 0xb07   : > { %v3858_v10 = vpop.f32.mrb[23].mxu0  ;;  %v3864_v14 = vpop.f32.mrb[31].mxu1 }
 0xb0c   : > { %v2733_v17 = vpop.f32.mrb[24].mxu0  ;;  %v2779_v15 = vpop.f32.mrb[32].mxu1 }
 0xb0d   : > { %v3869_v16 = vpop.f32.mrb[25].mxu0  ;;  %v3875_v18 = vpop.f32.mrb[33].mxu1  ;;  %v2791_v19 = vsel %vm1346_vm2, %v2733_v17, -inf  ;;  %v2794_v29 = vsel %vm1346_vm2, %v2779_v15, -inf }
 0xb0e   : > { %2792 = vmax.xlane.f32.xlu0 %v2791_v19  ;;  %v2736_v20 = vpop.f32.mrb[26].mxu0  ;;  %v2782_v21 = vpop.f32.mrb[34].mxu1 }
 0xb0f   : > { %v3870_v22 = vpop.f32.mrb[27].mxu0  ;;  %v3876_v25 = vpop.f32.mrb[35].mxu1 }
 0xb12   : > { %2795 = vmax.xlane.f32.xlu0 %v2794_v29 }
 0xb17   : > { %2449 = vrot.lane.b32.xlu1 %v5118_v8, %s4478_s12 }
 0xb93   : > { %v2787_v30 = vpop.xlane.xlu0 %2786  ;;  %v2790_v31 = vpop.xlane.xlu1 %2789 }
 0xb94   : > { %v2797_v32 = vsub.f32 %v2641_v62, %v2787_v30  ;;  %v2798_v36 = vsub.f32 %v2687_v63, %v2790_v31 }
 0xb96   : > { %v2801_v11 = vmul.f32 1.442695, %v2797_v32  ;;  %v2803_v7 = vmul.f32 1.442695, %v2798_v36 }
 0xb98   : > { %4107 = vpow2.f32 %v2801_v11 }
 0xb99   : > { %4109 = vpow2.f32 %v2803_v7 }
 0xb9b   : > { %v2793_v8 = vpop.xlane.xlu0 %2792 }
 0xb9c   : > { %v2799_v41 = vsub.f32 %v2733_v17, %v2793_v8 }
 0xb9e   : > { %v2805_v44 = vmul.f32 1.442695, %v2799_v41 }
 0xb9f   : > { %v2796_v34 = vpop.xlane.xlu0 %2795 }
 0xba0   : > { %v2800_v35 = vsub.f32 %v2779_v15, %v2796_v34  ;;  %4111 = vpow2.f32 %v2805_v44 }
 0xba2   : > { %v5216_v37 = vpop.eup %4107  ;;  %v2807_v13 = vmul.f32 1.442695, %v2800_v35 }
 0xba3   : > { %v5218_v38 = vpop.eup %4109  ;;  %v2809_v39 = vsel %vm1346_vm2, %v5216_v37, 0.0 }
 0xba4   : > { %2810 = vadd.xlane.f32.xlu1 %v2809_v39  ;;  %v2812_v40 = vsel %vm1346_vm2, %v5218_v38, 0.0  ;;  %4113 = vpow2.f32 %v2807_v13 }
 0xba5   : > { %2813 = vadd.xlane.f32.xlu0 %v2812_v40 }
 0xbaa   : > { %v5230_v12 = vpop.eup %4111 }
 0xbae   : > { %v5232_v45 = vpop.eup %4113 }
 0xbb5   : > { %2453 = vrot.lane.b32.xlu1 %v5135_v27, %s4478_s12  ;;  %v2815_v27 = vsel %vm1346_vm2, %v5230_v12, 0.0 }
 0xbb9   : > { %2455 = vrot.lane.b32.xlu1 %v5137_v28, %s4478_s12  ;;  %v2818_v28 = vsel %vm1346_vm2, %v5232_v45, 0.0 }
 0xbbb   : > { %2451 = vrot.lane.b32.xlu0 %v5133_v26, %s4478_s12  ;;  %v2450_v26 = vpop.permute.xlu1 %2449  ;;  %s804_s12 = sand.u32 1, %s5490_s6  }
 0xbbc   : > { %s3643_s29 = sshll.u32 %s804_s12, 3 }
 0xbbd   : > { %s806_s28 = scalar_lea.vmem [#allocation17], %s3643_s29  ;;  %s4383_s29 = sshll.u32 %s4486_s4, 4  ;;  %s4384_s29 = int_to_ptr.vmem [resolvable:$false] %s4383_s29 }
 0xbbe   : > { %s3462_s19 = sshll.u32 %s806_s28, 4  ;;  %s5358_s19 = int_to_ptr.vmem [resolvable:$true] %s3462_s19 }
 0xbbf   : > { %s4379_s6 = scalar_lea.vmem %s5358_s19, 128  ;;  %p4386_p0 = scmp.lt.s32.totalorder %s5358_s19, %s4384_s29 }
 0xbc0   : > { %p4380_p8 = scmp.ne.s32.totalorder %s5358_s19, %s4379_s6 }
 0xbc2   : > { %p4381_p13 = pnand %p4380_p8, %p5495_p11 }
 0xbc4   : > { %p4382_p1 = pneg %p4381_p13 }
 0xbda   : > { %2816 = vadd.xlane.f32.xlu0 %v2815_v27 }
 0xbdd   : > { %2819 = vadd.xlane.f32.xlu1 %v2818_v28 }
 0xc31   : > { %v2811_v46 = vpop.xlane.xlu1 %2810 }
 0xc32   : > { %v2814_v47 = vpop.xlane.xlu0 %2813  ;;  %4115 = vrcp.f32 %v2811_v46 }
 0xc33   : > { %4117 = vrcp.f32 %v2814_v47 }
 0xc35   : > { %v2454_v48 = vpop.permute.xlu1 %2453 }
 0xc36   : > { %v2461_v49 = vcombine.low %v2450_v26, %v2454_v48  ;;  %v2462_v50 = vcombine.high %v2450_v26, %v2454_v48  ;;  %v2452_v51 = vpop.permute.xlu0 %2451 }
 0xc38   : > { %v2469_v42 = vrot.slane %v2461_v49, %v4942_v23  ;;  %v2476_v55 = vrot.slane %v2462_v50, %v4942_v23 }
 0xc39   : > { %v2456_v52 = vpop.permute.xlu1 %2455 }
 0xc3a   : > { %v2477_v53 = vcombine.low %v2452_v51, %v2456_v52  ;;  %v2478_v54 = vcombine.high %v2452_v51, %v2456_v52 }
 0xc3c   : > { %v2485_v43 = vrot.slane %v2477_v53, %v4942_v23  ;;  %v2492_v56 = vrot.slane %v2478_v54, %v4942_v23  ;;  %v4116_v21 = vpop.eup %4115 }
 0xc3d   : > { %v4118_v29 = vpop.eup %4117  ;;  %v2825_v11 = vmul.f32 %v4116_v21, %v5216_v37 }
 0xc3e   : > { %v2493_v57 = vcombine.low %v2469_v42, %v2485_v43  ;;  %v2494_v58 = vcombine.high %v2469_v42, %v2485_v43  ;;  %v2509_v59 = vcombine.low %v2476_v55, %v2492_v56  ;;  %v2510_v3 = vcombine.high %v2476_v55, %v2492_v56 }
 0xc3f   : > { %v2826_v7 = vmul.f32 %v4118_v29, %v5218_v38  ;;  %v2829_v44 = vpack.c.bf16 %v2825_v11, %v2825_v11 }
 0xc40   : > { %v2501_v60 = vrot.slane %v2493_v57, %v4953_v33  ;;  %v2508_v61 = vrot.slane %v2494_v58, %v4953_v33  ;;  %v2517_v62 = vrot.slane %v2509_v59, %v4953_v33  ;;  %v2524_v63 = vrot.slane %v2510_v3, %v4953_v33 }
 0xc41   : > { %v2830_v13 = vpack.c.bf16 %v2826_v7, %v2826_v7 }
 0xc42   : > { %v2529_v1 = vcombine.low %v2501_v60, %v2508_v61  ;;  %v3684_v2 = vcombine.high %v2501_v60, %v2508_v61  ;;  %v2545_v4 = vcombine.low %v2517_v62, %v2524_v63  ;;  %v3685_v5 = vcombine.high %v2517_v62, %v2524_v63 }
 0xc44   : > { %v2536_v6 = vrot.slane %v2529_v1, %v4942_v23  ;;  %v2544_v9 = vrot.slane %v3684_v2, %v4942_v23  ;;  %v2552_v10 = vrot.slane %v2545_v4, %v4942_v23  ;;  %v2560_v14 = vrot.slane %v3685_v5, %v4942_v23 }
 0xc46   : > { %v2561_v17 = vcombine.low %v2536_v6, %v2544_v9  ;;  %v2562_v15 = vcombine.high %v2536_v6, %v2544_v9  ;;  %v2577_v16 = vcombine.low %v2552_v10, %v2560_v14  ;;  %v2578_v18 = vcombine.high %v2552_v10, %v2560_v14 }
 0xc48   : > { %v2569_v19 = vrot.slane %v2561_v17, %v4953_v33  ;;  %v2576_v20 = vrot.slane %v2562_v15, %v4953_v33  ;;  %v2585_v22 = vrot.slane %v2577_v16, %v4953_v33  ;;  %v2592_v25 = vrot.slane %v2578_v18, %v4953_v33  ;;  %v4081_v16 = vld [vmem:[#allocation14] sm:$0xff]  }
 0xc4a   : > { %v2593_v30 = vcombine.low %v2569_v19, %v2585_v22  ;;  %v2594_v31 = vcombine.high %v2569_v19, %v2585_v22  ;;  %v2595_v32 = vcombine.low %v2576_v20, %v2592_v25  ;;  %v2596_v36 = vcombine.high %v2576_v20, %v2592_v25 }
 0xc4c   : > { %v2597_v39 = vpack.c.bf16 %v2593_v30, %v2593_v30  ;;  %v2598_v40 = vpack.c.bf16 %v2594_v31, %v2594_v31  ;;  %v2599_v34 = vpack.c.bf16 %v2595_v32, %v2595_v32  ;;  %v2600_v35 = vpack.c.bf16 %v2596_v36, %v2596_v36  ;;  %v4082_v31 = vld [vmem:[#allocation14 + $0x8] sm:$0xff]  }
 0xc4e   : > { %v2837_v8 = vsel %vm1582_vm4, %v2597_v39, 0  ;;  %v2883_v41 = vsel %vm1582_vm4, %v2598_v40, 0  ;;  %v2929_v37 = vsel %vm1582_vm4, %v2599_v34, 0  ;;  %v2975_v38 = vsel %vm1582_vm4, %v2600_v35, 0 }
 0xc4f   : > { %3878 = vmatpush3.bf16.msra.mxu0 %v2837_v8  ;;  %3884 = vmatpush3.bf16.msra.mxu1 %v2883_v41 }
 0xc50   : > { %3889 = vmatprep.subr.bf16.mxu0 %v4474_v0  ;;  %3895 = vmatprep.subr.bf16.mxu1 %v4474_v0 }
 0xc52   : > { %3880 = vmatmul.mubr.msk.bf16.vlgmr.msra.gmra.mrb[28].mxu0 %vm1346_vm2, %v2829_v44  ;;  %3886 = vmatmul.mubr.msk.bf16.vlgmr.msra.gmra.mrb[36].mxu1 %vm1346_vm2, %v2830_v13 }
 0xc53   : > { %3890 = vmatpush3.bf16.msra.mxu0 %v2929_v37  ;;  %3896 = vmatpush3.bf16.msra.mxu1 %v2975_v38 }
 0xc54   : > { %3891 = vmatprep.mubr.msk.bf16.mxu0 %vm4475_vm0, %v4474_v0  ;;  %3897 = vmatprep.mubr.msk.bf16.mxu1 %vm4475_vm0, %v4474_v0 }
 0xc55   : > { %3901 = vmatprep.subr.bf16.mxu0 %v4474_v0  ;;  %3909 = vmatprep.subr.bf16.mxu1 %v4474_v0 }
 0xc67   : > { %v2817_v27 = vpop.xlane.xlu0 %2816 }
 0xc68   : > { %4119 = vrcp.f32 %v2817_v27 }
 0xc6a   : > { %v2820_v28 = vpop.xlane.xlu1 %2819 }
 0xc6b   : > { %4121 = vrcp.f32 %v2820_v28 }
 0xc72   : > { %v4120_v26 = vpop.eup %4119 }
 0xc73   : > { %v2827_v46 = vmul.f32 %v4120_v26, %v5230_v12 }
 0xc75   : > { %v4122_v47 = vpop.eup %4121  ;;  %v2831_v48 = vpack.c.bf16 %v2827_v46, %v2827_v46 }
 0xc76   : > { %v2828_v49 = vmul.f32 %v4122_v47, %v5232_v45 }
 0xc77   : > { %3892 = vmatmul.mubr.msk.bf16.vlgmr.msra.gmra.mrb[32].mxu0 %vm1346_vm2, %v2831_v48 }
 0xc78   : > { %v2832_v50 = vpack.c.bf16 %v2828_v49, %v2828_v49  ;;  %3905 = vmatprep.mubr.msk.bf16.mxu0 %vm4475_vm0, %v4474_v0  ;;  %3902 = vmatpush3.bf16.msra.mxu0 %v4081_v16 }
 0xc79   : > { %3903 = vmatprep.subr.bf16.mxu0 %v4474_v0 }
 0xc7a   : > { %3898 = vmatmul.mubr.msk.bf16.vlgmr.msra.gmra.mrb[40].mxu1 %vm1346_vm2, %v2832_v50  ;;  %v3696_v50 = vld [vmem:[#allocation16] ss:$0 sm:$0xff] }
 0xc7b   : > { %3913 = vmatprep.mubr.msk.bf16.mxu1 %vm4475_vm0, %v4474_v0 }
 0xc7c   : > { %3904 = vmatpush3.bf16.msra.mxu0 %v4082_v31 }
 0xc7d   : > { %3917 = vmatprep.subr.bf16.mxu0 %v4474_v0 }
 0xd25   : > { %v2873_v51 = vpop.f32.mrb[28].mxu0  ;;  %v2919_v52 = vpop.f32.mrb[36].mxu1 }
 0xd26   : > { %v3881_v53 = vpop.f32.mrb[29].mxu0  ;;  %v3887_v54 = vpop.f32.mrb[37].mxu1 }
 0xd27   : > { %v2876_v12 = vpop.f32.mrb[30].mxu0  ;;  %v2922_v42 = vpop.f32.mrb[38].mxu1 }
 0xd28   : > { %v3882_v55 = vpop.f32.mrb[31].mxu0  ;;  %v3888_v43 = vpop.f32.mrb[39].mxu1 }
 0xd4a   : > { %v2965_v45 = vpop.f32.mrb[32].mxu0 }
 0xd4b   : > { %v3017_v56 = vcombine.low %v2873_v51, %v2965_v45  ;;  %v3018_v57 = vcombine.high %v2873_v51, %v2965_v45  ;;  %v3893_v58 = vpop.f32.mrb[33].mxu0 }
 0xd4c   : > { %v2968_v59 = vpop.f32.mrb[34].mxu0 }
 0xd4d   : > { %v3894_v3 = vpop.f32.mrb[35].mxu0  ;;  %v3011_v60 = vpop.f32.mrb[40].mxu1  ;;  %v3025_v2 = vrot.slane %v3017_v56, %v4942_v23  ;;  %v3032_v4 = vrot.slane %v3018_v57, %v4942_v23  ;;  %v4083_v59 = vld [vmem:[%s5415_s16] sm:$0xff]  }
 0xd4e   : > { %v3033_v61 = vcombine.low %v2919_v52, %v3011_v60  ;;  %v3034_v62 = vcombine.high %v2919_v52, %v3011_v60  ;;  %v3899_v63 = vpop.f32.mrb[41].mxu1  ;;  %3910 = vmatpush3.bf16.msra.mxu1 %v4083_v59  ;;  %v4084_v3 = vld [vmem:[%s5415_s16 + $0x8] sm:$0xff]  }
 0xd4f   : > { %v3014_v1 = vpop.f32.mrb[42].mxu1  ;;  %3911 = vmatprep.subr.bf16.mxu1 %v4474_v0  ;;  %v4086_v60 = vld [vmem:[%s5417_s18 + $0x8] sm:$0xff]  }
 0xd50   : > { %v3041_v5 = vrot.slane %v3033_v61, %v4942_v23  ;;  %v3048_v6 = vrot.slane %v3034_v62, %v4942_v23  ;;  %v3900_v9 = vpop.f32.mrb[43].mxu1 }
 0xd52   : > { %v3049_v10 = vcombine.low %v3025_v2, %v3041_v5  ;;  %v3050_v14 = vcombine.high %v3025_v2, %v3041_v5  ;;  %v3065_v17 = vcombine.low %v3032_v4, %v3048_v6  ;;  %v3066_v15 = vcombine.high %v3032_v4, %v3048_v6  ;;  %3912 = vmatpush3.bf16.msra.mxu1 %v4084_v3  ;;  %v3700_v2 = vld [vmem:[%s5413_s14] ss:$0 sm:$0xff] }
 0xd53   : > { %v3701_v5 = vld [vmem:[%s5414_s15] ss:$0 sm:$0xff] }
 0xd54   : > { %v3057_v18 = vrot.slane %v3049_v10, %v4953_v33  ;;  %v3064_v19 = vrot.slane %v3050_v14, %v4953_v33  ;;  %v3073_v20 = vrot.slane %v3065_v17, %v4953_v33  ;;  %v3080_v21 = vrot.slane %v3066_v15, %v4953_v33  ;;  %v4087_v14 = vld [vmem:[%s5417_s18 + $0x10] sm:$0xff]   ;;  %v4088_v17 = vld [vmem:[%s5417_s18 + $0x18] sm:$0xff]   ;;  %v3702_v15 = vld [vmem:[%s5416_s17] ss:$0 sm:$0xff] }
 0xd56   : > { %v3085_v22 = vcombine.low %v3057_v18, %v3064_v19  ;;  %v3694_v25 = vcombine.high %v3057_v18, %v3064_v19  ;;  %v3101_v29 = vcombine.low %v3073_v20, %v3080_v21  ;;  %v3695_v30 = vcombine.high %v3073_v20, %v3080_v21 }
 0xd58   : > { %v3092_v32 = vrot.slane %v3085_v22, %v4942_v23  ;;  %v3100_v36 = vrot.slane %v3694_v25, %v4942_v23  ;;  %v3108_v11 = vrot.slane %v3101_v29, %v4942_v23  ;;  %v3116_v7 = vrot.slane %v3695_v30, %v4942_v23 }
 0xd5a   : > { %v3118_v39 = vcombine.high %v3092_v32, %v3100_v36  ;;  %v3134_v40 = vcombine.high %v3108_v11, %v3116_v7  ;;  %v3117_v8 = vcombine.low %v3092_v32, %v3100_v36  ;;  %v3133_v41 = vcombine.low %v3108_v11, %v3116_v7 }
 0xd5c   : > { %v3132_v34 = vrot.slane %v3118_v39, %v4953_v33  ;;  %v3148_v35 = vrot.slane %v3134_v40, %v4953_v33  ;;  %v3125_v44 = vrot.slane %v3117_v8, %v4953_v33  ;;  %v3141_v13 = vrot.slane %v3133_v41, %v4953_v33 }
 0xd5e   : > { %v3151_v37 = vcombine.low %v3132_v34, %v3148_v35  ;;  %v3150_v38 = vcombine.high %v3125_v44, %v3141_v13  ;;  %v3152_v27 = vcombine.high %v3132_v34, %v3148_v35  ;;  %v3149_v28 = vcombine.low %v3125_v44, %v3141_v13 }
 0xd60   : > { %3158 = vrot.lane.b32.xlu1 %v3151_v37, %s4483_s0  ;;  %3154 = vrot.lane.b32.xlu0 %v3150_v38, %s4484_s10  ;;  %s4385_s0 = scalar_lea.vmem %s4384_s29, 256 }
 0xd61   : > { %p4387_p6 = scmp.lt.s32.totalorder %s4385_s0, %s4379_s6 }
 0xd63   : > { %p4388_p5 = por %p4387_p6, %p4386_p0 }
 0xd64   : > { %3162 = vrot.lane.b32.xlu0 %v3152_v27, %s4485_s30  ;;  %s5492_s30 = sld [smem:[#allocation43_spill]] }
 0xd65   : > { %p4389_p9 = pnand %p4388_p5, %p4382_p1 }
 0xd6a   : > { %v3712_v38 = vld [vmem:[%s5492_s30] ss:$0 sm:$0xff] }
 0xdd2   : > { %v3155_v23 = vpop.permute.xlu0 %3154  ;;  %v3159_v26 = vpop.permute.xlu1 %3158 }
 0xdd3   : > { %v3165_v46 = vsel %vm1346_vm2, %v3149_v28, %v3155_v23  ;;  %v3713_v28 = vld [vmem:[%s5493_s23] ss:$0 sm:$0xff] }
 0xdd4   : > { %v3166_v48 = vsel %vm1913_vm5, %v3165_v46, %v3159_v26 }
 0xdd6   : > { %v3163_v47 = vpop.permute.xlu0 %3162 }
 0xdd7   : > { %v3167_v49 = vsel %vm1915_vm6, %v3166_v48, %v3163_v47 }
 0xdd8   : > { %v3168_v33 = vpack.c.bf16 %v3167_v49, %v3167_v49 }
 0xdda   : > { %3906 = vmatmul.mubr.msk.bf16.vlgmr.msra.gmra.mrb[36].mxu0 %vm848_vm1, %v3168_v33 }
 0xddb   : > { %3925 = vmatprep.mubr.msk.bf16.mxu0 %vm4475_vm0, %v4474_v0 }
 0xead   : > { %v3229_v51 = vpop.f32.mrb[36].mxu0 }
 0xeae   : > { %v3230_v52 = vadd.f32 %v3696_v50, %v3229_v51  ;;  %v3907_v53 = vpop.f32.mrb[37].mxu0 }
 0xeaf   : > { %v3232_v54 = vpop.f32.mrb[38].mxu0 }
 0xeb0   : > { %v3908_v12 = vpop.f32.mrb[39].mxu0  ;;  %v3235_v42 = vadd.f32 %v3230_v52, %v5126_v24  ;;  %v4085_v24 = vld [vmem:[%s5417_s18] sm:$0xff]  }
 0xeb1   : > { %3918 = vmatpush3.bf16.msra.mxu0 %v4085_v24 }
 0xeb2   : > { %v3236_v55 = vsel %vm848_vm1, %v3235_v42, 0.0  ;;  %3919 = vmatprep.subr.bf16.mxu0 %v4474_v0 }
 0xeb3   : > { %3237 = vadd.xlane.f32.xlu1 %v3236_v55 }
 0xeb5   : > { %3920 = vmatpush3.bf16.msra.mxu0 %v4086_v60 }
 0xeb6   : > { %3921 = vmatprep.subr.bf16.mxu0 %v4474_v0 }
 0xeb9   : > { %3922 = vmatpush3.bf16.msra.mxu0 %v4087_v14 }
 0xeba   : > { %3923 = vmatprep.subr.bf16.mxu0 %v4474_v0  ;;  %v3706_v0 = vld [vmem:[%s5489_s20] ss:$0 sm:$0xff]  ;;  %s3449_s20 = scalar_lea.sflag [#allocation4], %s804_s12 }
 0xebd   : > { %3924 = vmatpush3.bf16.msra.mxu0 %v4088_v17 }
 0xf40   : > { %v3238_v43 = vpop.xlane.xlu1 %3237 }
 0xf41   : > { %v3239_v45 = vmul.f32 0.03125, %v3238_v43 }
 0xf43   : > { %v3240_v56 = vsub.f32 %v3235_v42, %v3239_v45 }
 0xf45   : > { %v3241_v57 = vmul.f32 %v3240_v56, %v3240_v56 }
 0xf47   : > { %v3242_v58 = vsel %vm848_vm1, %v3241_v57, 0.0 }
 0xf48   : > { %3243 = vadd.xlane.f32.xlu0 %v3242_v58 }
 0xfd5   : > { %v3244_v61 = vpop.xlane.xlu0 %3243 }
 0xfd6   : > { %v3245_v62 = vmul.f32 0.03125, %v3244_v61 }
 0xfd8   : > { %v3246_v63 = vadd.f32 1e-05, %v3245_v62 }
 0xfda   : > { %4123 = vrsqrt.f32 %v3246_v63 }
 0xfe4   : > { %v4124_v1 = vpop.eup %4123 }
 0xfe5   : > { %v3248_v4 = vmul.f32 %v4124_v1, %v3240_v56 }
 0xfe7   : > { %v3256_v6 = vmul.f32 %v3700_v2, %v3248_v4 }
 0xfe9   : > { %v3264_v9 = vadd.f32 %v3701_v5, %v3256_v6 }
 0xfeb   : > { %v3265_v10 = vpack.c.bf16 %v3264_v9, %v3264_v9 }
 0xfed   : > { %3914 = vmatmul.mubr.msk.bf16.vlgmr.msra.gmra.mrb[44].mxu1 %vm848_vm1, %v3265_v10 }
0x10c0   : > { %v3326_v16 = vpop.f32.mrb[44].mxu1 }
0x10c1   : > { %v3327_v18 = vadd.f32 %v3702_v15, %v3326_v16  ;;  %v3915_v19 = vpop.f32.mrb[45].mxu1 }
0x10c2   : > { %v3329_v20 = vpop.f32.mrb[46].mxu1 }
0x10c3   : > { %v3332_v21 = vmax.f32 %v3327_v18, 0.0  ;;  %v3916_v22 = vpop.f32.mrb[47].mxu1 }
0x10c5   : > { %v3333_v25 = vpack.c.bf16 %v3332_v21, %v3332_v21 }
0x10c7   : > { %3926 = vmatmul.mubr.msk.bf16.vlgmr.msra.gmra.mrb[40].mxu0 %vm3373_vm7, %v3333_v25 }
0x119a   : > { %v3411_v29 = vpop.f32.mrb[40].mxu0 }
0x119b   : > { %v3412_v30 = vadd.f32 %v3706_v0, %v3411_v29  ;;  %v3927_v31 = vpop.f32.mrb[41].mxu0 }
0x119c   : > { %v3414_v32 = vpop.f32.mrb[42].mxu0 }
0x119d   : > { %v3928_v36 = vpop.f32.mrb[43].mxu0  ;;  %v3417_v11 = vadd.f32 %v3412_v30, %v3264_v9 }
0x119f   : > { %v3418_v7 = vsel %vm848_vm1, %v3417_v11, 0.0 }
0x11a0   : > { %3419 = vadd.xlane.f32.xlu0 %v3418_v7 }
0x122d   : > { %v3420_v39 = vpop.xlane.xlu0 %3419 }
0x122e   : > { %v3421_v40 = vmul.f32 0.03125, %v3420_v39 }
0x1230   : > { %v3422_v8 = vsub.f32 %v3417_v11, %v3421_v40 }
0x1232   : > { %v3423_v41 = vmul.f32 %v3422_v8, %v3422_v8 }
0x1234   : > { %v3424_v34 = vsel %vm848_vm1, %v3423_v41, 0.0 }
0x1235   : > { %3425 = vadd.xlane.f32.xlu1 %v3424_v34 }
0x12c2   : > { %v3426_v35 = vpop.xlane.xlu1 %3425 }
0x12c3   : > { %v3427_v44 = vmul.f32 0.03125, %v3426_v35 }
0x12c5   : > { %v3428_v13 = vadd.f32 1e-05, %v3427_v44 }
0x12c7   : > { %4125 = vrsqrt.f32 %v3428_v13 }
0x12d1   : > { %v4126_v37 = vpop.eup %4125 }
0x12d2   : > { %v3430_v27 = vmul.f32 %v4126_v37, %v3422_v8 }
0x12d4   : > { %v3438_v23 = vmul.f32 %v3712_v38, %v3430_v27 }
0x12d6   : > { %v3446_v26 = vadd.f32 %v3713_v28, %v3438_v23 }
0x12d8   : > { %3447 = vst.msk [vmem:[%s806_s28] sm:$0xff] %vm848_vm1, %v3446_v26 }
0x12d9   : > { %4392 = shalt.err (!%p4389_p9)
}
0x12da   : > { %s4393_s12 = scalar_lea.hbm %s5356_s5, 128  ;;  %s4397_s25 = scalar_lea.hbm %s5494_s26, 256 }
0x12db   : > { %p4394_p12 = scmp.ne.s32.totalorder %s5356_s5, %s4393_s12  ;;  %p4398_p3 = scmp.lt.u32.totalorder %s5356_s5, %s5494_s26 }
0x12dc   : > { %p4399_p4 = scmp.lt.u32.totalorder %s4397_s25, %s4393_s12  ;;  %p4401_p8 = scmp.lt.u32.totalorder %s4393_s12, %s5356_s5 }
0x12dd   : > { %p4395_p10 = pnand %p4394_p12, %p5495_p11 }
0x12de   : > { %p4400_p7 = por %p4399_p4, %p4398_p3 }
0x12df   : > { %p4396_p2 = pneg %p4395_p10 }
0x12e0   : > { %p4402_p13 = por %p4401_p8, %p4400_p7 }
0x12e2   : > { %p4403_p1 = pnand %p4402_p13, %p4396_p2 }
0x12e4   : > { %4406 = shalt.err (!%p4403_p1)
}
0x12e5   : > { %3965 = dma.vmem_to_hbm [thread:$0]  (%p5495_p11), %s5358_s19, 128, %s5356_s5, %s3449_s20  }
0x12e6 PF: > { %s5496_s21 = sld [smem:[#allocation27_spill]]  ;;  %s5497_s28 = sld [smem:[#allocation24_spill]] }
0x12e7   : > { %s5498_s3 = sld [smem:[#allocation31_spill]] }
0x12ec   : > { %p4017_p0 = scmp.ge.s32.totalorder %s5496_s21, 2  ;;  %s3474_s22 = sand.u32 1, %s5497_s28  }
0x12ed   : > { %p5499_p6 = scmp.ne.s32.totalorder %s5498_s3, 0  ;;  %s3475_s6 = scalar_lea.sflag [#allocation4], %s3474_s22 }
0x12ef   : > { %p3996_p5 = pnand %p4017_p0, %p5499_p6 }
0x12f1   : > { %4444 = dma.done.wait (!%p3996_p5), %s3475_s6, 128  }
0x12f2   : > { %4446 = vsyncadd (!%p3996_p5), %s3475_s6, 4294967168  ;;  %s5500_s30 = sld [smem:[#allocation28_spill]]  ;;  %s5501_s3 = sld [smem:[#allocation25_spill]] }
0x12f3   : > { %s5502_s28 = sld [smem:[#allocation26_spill]]  ;;  %s5503_s29 = sld [smem:[#allocation29_spill]] }
0x12f8   : > { %p37_p9 = scmp.ge.s32.totalorder %s5500_s30, 4  }
0x12fa   :  { %39 = sbr.rel (!%p37_p9) target bundleno = 23 (0x17), region = 183 }
0x1301   :  { %3480 = vsyncpa [#allocation3], 1 }
0x1302   :  { %3482 = vsyncpa [#allocation3 + $0x1], 1 }
0x1303   :  { %3483 = vsyncpa [#allocation6], 1 }
0x1304   :  { %3484 = vsyncpa [#allocation9], 1 }
0x1305   :  { %3485 = vsyncpa [#allocation12], 1 }
0x1306   :  { %3486 = vsyncpa [#allocation15], 1 }
0x1307   :  { %3487 = vsyncpa [#allocation4], 1 }
0x1308   :  { %3489 = vsyncpa [#allocation4 + $0x1], 1 }

</bundles_post_ra>
